<compile_context>
chip_gen: v5e
topology: v5e:2x2
jax: 0.10.0
libtpu: 0.0.40
codegen_flags: <defaults>
</compile_context>

<pallas_src>
import functools
import math

import jax
import jax.numpy as jnp
import numpy as np
from jax.experimental import pallas as pl
from jax.experimental.pallas import tpu as pltpu

# ------------------------- model hyper-parameters ---------------------------
B = 2          # batch (slates)
S = 8          # sequence length (num candidates)
D = 32         # dim_model
H = 4          # num attention heads
DK = D // H    # per-head dim
FF = 64        # dim_feedforward
L = 2          # num_layers
EPS = 1e-5     # nn.LayerNorm default eps
NEG_INF = -1e9  # large finite negative (avoids inf arithmetic / NaN hazard)


def _layer_norm(x, gamma, beta, eps=EPS):
    mu = jnp.mean(x, axis=-1, keepdims=True)
    var = jnp.mean((x - mu) ** 2, axis=-1, keepdims=True)
    return (x - mu) * jax.lax.rsqrt(var + eps) * gamma + beta


# ------------------------------- kernel -------------------------------------
def _encoder_kernel(num_layers, num_heads,
                    x_ref, maskb_ref, wqkv_ref, wo_ref, w1_ref, w2_ref,
                    bias_ref, lnf_ref, out_ref):
    rows, dim = x_ref.shape
    d_k = dim // num_heads

    x = x_ref[...].astype(jnp.float32)                        # (R, D)

    # Hoisted: broadcast the (R, R) block-diagonal mask bias to (H, R, R) once.
    # (JAX does not CSE broadcast_in_dim -> keep it out of the layer loop.)
    mask3 = jnp.broadcast_to(maskb_ref[...][None, :, :],
                             (num_heads, rows, rows))          # (H, R, R)

    for l in range(num_layers):
        # ---- per-layer parameters, loaded once and hoisted ----
        bs = bias_ref[l]                                       # (8, 3D) slab
        ln1g, ln1b = bs[0:1, :dim], bs[1:2, :dim]
        ln2g, ln2b = bs[2:3, :dim], bs[3:4, :dim]
        b_o, b_2 = bs[4:5, :dim], bs[5:6, :dim]
        b_qkv = bs[6:7, :]                                     # (1, 3D)  Q part pre-scaled
        w_qkv = wqkv_ref[l]                                    # (D, 3D)  Q cols pre-scaled
        w_o = wo_ref[l]                                        # (D, D)
        w_1 = w1_ref[l]                                        # (D, FF)
        w_2 = w2_ref[l]                                        # (FF, D)
        b_1 = bs[7:8, :w_1.shape[-1]]                          # (1, FF)

        # ---- sublayer 0: x = x + SelfAttn(LayerNorm(x), mask) ----
        xn = _layer_norm(x, ln1g, ln1b)                        # (R, D)
        # one fused, lane-dense QKV projection for all rows
        qkv = jnp.dot(xn, w_qkv, preferred_element_type=jnp.float32) + b_qkv  # (R, 3D)

        # head-batched q/k/v with a single leading batch dim: (H, R, DK)
        q3 = jnp.stack([qkv[:, h * d_k:(h + 1) * d_k]
                        for h in range(num_heads)], axis=0)
        k3 = jnp.stack([qkv[:, dim + h * d_k: dim + (h + 1) * d_k]
                        for h in range(num_heads)], axis=0)
        v3 = jnp.stack([qkv[:, 2 * dim + h * d_k: 2 * dim + (h + 1) * d_k]
                        for h in range(num_heads)], axis=0)

        # scores over the flattened rows: (H, R, R); 1/sqrt(d_k) already folded in
        scores = jnp.einsum('hqd,hkd->hqk', q3, k3,
                            preferred_element_type=jnp.float32) + mask3
        m = jnp.max(scores, axis=-1, keepdims=True)
        e = jnp.exp(scores - m)
        p = e / jnp.sum(e, axis=-1, keepdims=True)             # exact softmax

        # context, batched over heads: (H, R, DK)
        ctx = jnp.einsum('hqk,hkd->hqd', p, v3,
                         preferred_element_type=jnp.float32)
        # merge heads back along lanes; single output-projection matmul
        ctx2d = jnp.concatenate([ctx[h] for h in range(num_heads)], axis=-1)  # (R, D)
        x = x + jnp.dot(ctx2d, w_o, preferred_element_type=jnp.float32) + b_o

        # ---- sublayer 1: x = x + FFN(LayerNorm(x)) ----
        xn = _layer_norm(x, ln2g, ln2b)
        h1 = jnp.maximum(
            jnp.dot(xn, w_1, preferred_element_type=jnp.float32) + b_1, 0.0)
        x = x + jnp.dot(h1, w_2, preferred_element_type=jnp.float32) + b_2

    # final Encoder.norm
    out_ref[...] = _layer_norm(
        x, lnf_ref[0:1, :], lnf_ref[1:2, :]).astype(out_ref.dtype)


# --------------------------- parameter packing -------------------------------
def pack_params(p, num_heads):
    d = p["wq"].shape[-1]
    d_k = d // num_heads
    w3 = 3 * d
    inv_sqrt_dk = 1.0 / math.sqrt(d_k)

    # fold 1/sqrt(d_k) into the Q block ONLY (weights and bias)
    wqkv = jnp.concatenate([p["wq"] * inv_sqrt_dk, p["wk"], p["wv"]], axis=-1)  # (L, D, 3D)
    bqkv = jnp.concatenate([p["bq"] * inv_sqrt_dk, p["bk"], p["bv"]], axis=-1)  # (L, 1, 3D)

    def pad_row(v):
        return jnp.pad(v, ((0, 0), (0, 0), (0, w3 - v.shape[-1])))

    # (L, 8, 3D) slab: rows = ln1g, ln1b, ln2g, ln2b, bo, b2, bqkv, b1
    bias = jnp.concatenate(
        [pad_row(p["ln1g"]), pad_row(p["ln1b"]),
         pad_row(p["ln2g"]), pad_row(p["ln2b"]),
         pad_row(p["bo"]), pad_row(p["b2"]),
         bqkv, pad_row(p["b1"])], axis=1)
    lnf = jnp.concatenate([p["gf"], p["bf"]], axis=0)              # (2, D)
    return dict(wqkv=wqkv, wo=p["wo"], w1=p["w1"], w2=p["w2"],
                bias=bias, lnf=lnf)


# ------------------------------ wrapper --------------------------------------
def encoder_forward(x, mask, params, num_layers=L, num_heads=H):
    b, s, d = x.shape
    rows = b * s
    d_k = d // num_heads
    packed = pack_params(params, num_heads)
    ff = packed["w1"].shape[-1]

    x2 = x.reshape(rows, d)

    # Block-diagonal additive mask bias over the flattened (B*S) rows:
    #   within-slate blocks take the user mask (1 = attend -> 0 bias),
    #   cross-slate blocks are fully masked (-1e9).  This removes all per-batch
    #   handling from the kernel.  (Note: a fully-masked row would yield a
    #   uniform distribution instead of NaN, unlike torch's -inf masked_fill.)
    eye_b = jnp.eye(b, dtype=mask.dtype)
    mask_full = jnp.einsum('bc,bij->bicj', eye_b, mask).reshape(rows, rows)
    mask_bias = jnp.where(mask_full > 0, 0.0, NEG_INF).astype(jnp.float32)

    inputs = (x2, mask_bias, packed["wqkv"], packed["wo"],
              packed["w1"], packed["w2"], packed["bias"], packed["lnf"])

    kernel = functools.partial(_encoder_kernel, num_layers, num_heads)

    flops = num_layers * (
        2 * rows * d * 3 * d                       # fused QKV projection
        + 2 * 2 * num_heads * rows * rows * d_k    # scores + context
        + 2 * rows * d * d                         # output projection
        + 2 * 2 * rows * d * ff)                   # FFN (both matmuls)
    transcendentals = (num_layers * (num_heads * rows * rows    # exp
                                     + 2 * rows)                # layer-norm rsqrt
                       + rows)                                  # final norm rsqrt
    bytes_accessed = int(sum(int(np.prod(a.shape)) * a.dtype.itemsize for a in inputs)
                         + rows * d * x.dtype.itemsize)

    out = pl.pallas_call(
        kernel,
        out_shape=jax.ShapeDtypeStruct((rows, d), x.dtype),
        in_specs=[pl.BlockSpec(memory_space=pltpu.MemorySpace.VMEM)] * len(inputs),
        out_specs=pl.BlockSpec(memory_space=pltpu.MemorySpace.VMEM),
        cost_estimate=pl.CostEstimate(flops=flops,
                                      transcendentals=transcendentals,
                                      bytes_accessed=bytes_accessed),
    )(*inputs)
    return out.reshape(b, s, d)


# -------------------------- pure-JAX reference --------------------------------
def encoder_reference(x, mask, params, num_layers=L, num_heads=H):
    b, s, d = x.shape
    d_k = d // num_heads

    def ln(t, g, bta):
        mu = t.mean(-1, keepdims=True)
        var = ((t - mu) ** 2).mean(-1, keepdims=True)
        return (t - mu) / jnp.sqrt(var + EPS) * g + bta

    def split_heads(t):
        return t.reshape(b, s, num_heads, d_k).transpose(0, 2, 1, 3)

    for l in range(num_layers):
        xn = ln(x, params["ln1g"][l], params["ln1b"][l])
        q = xn @ params["wq"][l] + params["bq"][l]
        k = xn @ params["wk"][l] + params["bk"][l]
        v = xn @ params["wv"][l] + params["bv"][l]
        qh, kh, vh = split_heads(q), split_heads(k), split_heads(v)
        scores = (qh @ kh.transpose(0, 1, 3, 2)) / math.sqrt(d_k)
        scores = jnp.where(mask[:, None] > 0, scores, -jnp.inf)
        p = jax.nn.softmax(scores, axis=-1)
        o = (p @ vh).transpose(0, 2, 1, 3).reshape(b, s, d)
        x = x + (o @ params["wo"][l] + params["bo"][l])

        xn = ln(x, params["ln2g"][l], params["ln2b"][l])
        h1 = jnp.maximum(xn @ params["w1"][l] + params["b1"][l], 0.0)
        x = x + (h1 @ params["w2"][l] + params["b2"][l])
    return ln(x, params["gf"], params["bf"])


# ------------------------------ param init -----------------------------------
def init_params(key):
    keys = jax.random.split(key, 12)
    sc = 0.1
    p = {
        "wq": jax.random.normal(keys[0], (L, D, D), jnp.float32) * sc,
        "wk": jax.random.normal(keys[1], (L, D, D), jnp.float32) * sc,
        "wv": jax.random.normal(keys[2], (L, D, D), jnp.float32) * sc,
        "wo": jax.random.normal(keys[3], (L, D, D), jnp.float32) * sc,
        "bq": jax.random.normal(keys[4], (L, 1, D), jnp.float32) * 0.01,
        "bk": jax.random.normal(keys[5], (L, 1, D), jnp.float32) * 0.01,
        "bv": jax.random.normal(keys[6], (L, 1, D), jnp.float32) * 0.01,
        "bo": jax.random.normal(keys[7], (L, 1, D), jnp.float32) * 0.01,
        "w1": jax.random.normal(keys[8], (L, D, FF), jnp.float32) * sc,
        "b1": jax.random.normal(keys[9], (L, 1, FF), jnp.float32) * 0.01,
        "w2": jax.random.normal(keys[10], (L, FF, D), jnp.float32) * sc,
        "b2": jax.random.normal(keys[11], (L, 1, D), jnp.float32) * 0.01,
        # LayerNorm params (PyTorch default init: gamma=1, beta=0)
        "ln1g": jnp.ones((L, 1, D), jnp.float32),
        "ln1b": jnp.zeros((L, 1, D), jnp.float32),
        "ln2g": jnp.ones((L, 1, D), jnp.float32),
        "ln2b": jnp.zeros((L, 1, D), jnp.float32),
        "gf": jnp.ones((1, D), jnp.float32),
        "bf": jnp.zeros((1, D), jnp.float32),
    }
    return p


# --------------------------------- main ---------------------------------------
if __name__ == "__main__":
    key = jax.random.PRNGKey(0)
    kx, kp = jax.random.split(key)

    x = jax.random.normal(kx, (B, S, D), jnp.float32)
    # padding-style mask: batch 0 sees all 8 positions, batch 1 sees first 6.
    lens = jnp.array([8, 6])
    cols = jnp.arange(S)
    mask = (cols[None, None, :] < lens[:, None, None]).astype(jnp.float32)
    mask = jnp.tile(mask, (1, S, 1))          # (B, S, S)

    params = init_params(kp)

    out = jax.block_until_ready(encoder_forward(x, mask, params))
    ref = jax.block_until_ready(encoder_reference(x, mask, params))

    np.testing.assert_allclose(np.asarray(out), np.asarray(ref),
                               rtol=1e-3, atol=1e-3)

    print("KERNEL_OK")
</pallas_src>

<mosaic_0001>
module attributes {stable_mosaic.version = 11 : i64} {
  func.func @_encoder_kernel(%arg0: memref<16x32xf32, #tpu.memory_space<vmem>>, %arg1: memref<16x16xf32, #tpu.memory_space<vmem>>, %arg2: memref<2x32x96xf32, #tpu.memory_space<vmem>>, %arg3: memref<2x32x32xf32, #tpu.memory_space<vmem>>, %arg4: memref<2x32x64xf32, #tpu.memory_space<vmem>>, %arg5: memref<2x64x32xf32, #tpu.memory_space<vmem>>, %arg6: memref<2x8x96xf32, #tpu.memory_space<vmem>>, %arg7: memref<2x32xf32, #tpu.memory_space<vmem>>, %arg8: memref<16x32xf32, #tpu.memory_space<vmem>>) attributes {dimension_semantics = [], scalar_prefetch = 0 : i64, scratch_operands = 0 : i64, tpu.core_type = #tpu.core_type<tc>} {
    %c0 = arith.constant 0 : index
    %c0_0 = arith.constant 0 : index
    %0 = vector.load %arg0[%c0, %c0_0] : memref<16x32xf32, #tpu.memory_space<vmem>>, vector<16x32xf32>
    %c0_1 = arith.constant 0 : index
    %c0_2 = arith.constant 0 : index
    %1 = vector.load %arg1[%c0_1, %c0_2] : memref<16x16xf32, #tpu.memory_space<vmem>>, vector<16x16xf32>
    %2 = vector.shape_cast %1 : vector<16x16xf32> to vector<1x16x16xf32>
    %3 = vector.shape_cast %2 : vector<1x16x16xf32> to vector<1x16x16xf32>
    %4 = vector.broadcast %3 : vector<1x16x16xf32> to vector<4x16x16xf32>
    %c0_3 = arith.constant 0 : index
    %c0_4 = arith.constant 0 : index
    %c0_5 = arith.constant 0 : index
    %5 = vector.load %arg6[%c0_3, %c0_4, %c0_5] : memref<2x8x96xf32, #tpu.memory_space<vmem>>, vector<1x8x96xf32>
    %6 = vector.shape_cast %5 : vector<1x8x96xf32> to vector<8x96xf32>
    %7 = vector.extract_strided_slice %6 {offsets = [0, 0], sizes = [1, 32], strides = [1, 1]} : vector<8x96xf32> to vector<1x32xf32>
    %8 = vector.extract_strided_slice %6 {offsets = [1, 0], sizes = [1, 32], strides = [1, 1]} : vector<8x96xf32> to vector<1x32xf32>
    %9 = vector.extract_strided_slice %6 {offsets = [2, 0], sizes = [1, 32], strides = [1, 1]} : vector<8x96xf32> to vector<1x32xf32>
    %10 = vector.extract_strided_slice %6 {offsets = [3, 0], sizes = [1, 32], strides = [1, 1]} : vector<8x96xf32> to vector<1x32xf32>
    %11 = vector.extract_strided_slice %6 {offsets = [4, 0], sizes = [1, 32], strides = [1, 1]} : vector<8x96xf32> to vector<1x32xf32>
    %12 = vector.extract_strided_slice %6 {offsets = [5, 0], sizes = [1, 32], strides = [1, 1]} : vector<8x96xf32> to vector<1x32xf32>
    %13 = vector.extract_strided_slice %6 {offsets = [6, 0], sizes = [1, 96], strides = [1, 1]} : vector<8x96xf32> to vector<1x96xf32>
    %c0_6 = arith.constant 0 : index
    %c0_7 = arith.constant 0 : index
    %c0_8 = arith.constant 0 : index
    %14 = vector.load %arg2[%c0_6, %c0_7, %c0_8] : memref<2x32x96xf32, #tpu.memory_space<vmem>>, vector<1x32x96xf32>
    %15 = vector.shape_cast %14 : vector<1x32x96xf32> to vector<32x96xf32>
    %c0_9 = arith.constant 0 : index
    %c0_10 = arith.constant 0 : index
    %c0_11 = arith.constant 0 : index
    %16 = vector.load %arg3[%c0_9, %c0_10, %c0_11] : memref<2x32x32xf32, #tpu.memory_space<vmem>>, vector<1x32x32xf32>
    %17 = vector.shape_cast %16 : vector<1x32x32xf32> to vector<32x32xf32>
    %c0_12 = arith.constant 0 : index
    %c0_13 = arith.constant 0 : index
    %c0_14 = arith.constant 0 : index
    %18 = vector.load %arg4[%c0_12, %c0_13, %c0_14] : memref<2x32x64xf32, #tpu.memory_space<vmem>>, vector<1x32x64xf32>
    %19 = vector.shape_cast %18 : vector<1x32x64xf32> to vector<32x64xf32>
    %c0_15 = arith.constant 0 : index
    %c0_16 = arith.constant 0 : index
    %c0_17 = arith.constant 0 : index
    %20 = vector.load %arg5[%c0_15, %c0_16, %c0_17] : memref<2x64x32xf32, #tpu.memory_space<vmem>>, vector<1x64x32xf32>
    %21 = vector.shape_cast %20 : vector<1x64x32xf32> to vector<64x32xf32>
    %22 = vector.extract_strided_slice %6 {offsets = [7, 0], sizes = [1, 64], strides = [1, 1]} : vector<8x96xf32> to vector<1x64xf32>
    %cst = arith.constant dense<0.000000e+00> : vector<16xf32>
    %23 = vector.multi_reduction <add>, %0, %cst [1] : vector<16x32xf32> to vector<16xf32>
    %24 = vector.shape_cast %23 : vector<16xf32> to vector<16x1xf32>
    %cst_18 = arith.constant 3.200000e+01 : f32
    %25 = vector.broadcast %cst_18 : f32 to vector<16x1xf32>
    %26 = arith.divf %24, %25 : vector<16x1xf32>
    %27 = vector.broadcast %26 : vector<16x1xf32> to vector<16x32xf32>
    %28 = arith.subf %0, %27 : vector<16x32xf32>
    %29 = arith.mulf %28, %28 : vector<16x32xf32>
    %cst_19 = arith.constant dense<0.000000e+00> : vector<16xf32>
    %30 = vector.multi_reduction <add>, %29, %cst_19 [1] : vector<16x32xf32> to vector<16xf32>
    %31 = vector.shape_cast %30 : vector<16xf32> to vector<16x1xf32>
    %cst_20 = arith.constant 3.200000e+01 : f32
    %32 = vector.broadcast %cst_20 : f32 to vector<16x1xf32>
    %33 = arith.divf %31, %32 : vector<16x1xf32>
    %34 = vector.broadcast %26 : vector<16x1xf32> to vector<16x32xf32>
    %35 = arith.subf %0, %34 : vector<16x32xf32>
    %cst_21 = arith.constant 9.99999974E-6 : f32
    %36 = vector.broadcast %cst_21 : f32 to vector<16x1xf32>
    %37 = arith.addf %33, %36 : vector<16x1xf32>
    %38 = math.rsqrt %37 : vector<16x1xf32>
    %39 = vector.broadcast %38 : vector<16x1xf32> to vector<16x32xf32>
    %40 = arith.mulf %35, %39 : vector<16x32xf32>
    %41 = vector.broadcast %7 : vector<1x32xf32> to vector<16x32xf32>
    %42 = arith.mulf %40, %41 : vector<16x32xf32>
    %43 = vector.broadcast %8 : vector<1x32xf32> to vector<16x32xf32>
    %44 = arith.addf %42, %43 : vector<16x32xf32>
    %cst_22 = arith.constant dense<0.000000e+00> : vector<16x96xf32>
    %45 = tpu.matmul %44, %15, %cst_22 {dimension_numbers = #tpu.dot_dimension_numbers<[1], [0], [0], [1], [0, 0, 1, 1], [], []>} : vector<16x32xf32>, vector<32x96xf32>, vector<16x96xf32> -> vector<16x96xf32>
    %46 = vector.broadcast %13 : vector<1x96xf32> to vector<16x96xf32>
    %47 = arith.addf %45, %46 : vector<16x96xf32>
    %48 = vector.extract_strided_slice %47 {offsets = [0, 0], sizes = [16, 8], strides = [1, 1]} : vector<16x96xf32> to vector<16x8xf32>
    %49 = vector.extract_strided_slice %47 {offsets = [0, 8], sizes = [16, 8], strides = [1, 1]} : vector<16x96xf32> to vector<16x8xf32>
    %50 = vector.extract_strided_slice %47 {offsets = [0, 16], sizes = [16, 8], strides = [1, 1]} : vector<16x96xf32> to vector<16x8xf32>
    %51 = vector.extract_strided_slice %47 {offsets = [0, 24], sizes = [16, 8], strides = [1, 1]} : vector<16x96xf32> to vector<16x8xf32>
    %52 = vector.shape_cast %48 : vector<16x8xf32> to vector<1x16x8xf32>
    %53 = vector.shape_cast %49 : vector<16x8xf32> to vector<1x16x8xf32>
    %54 = vector.shape_cast %50 : vector<16x8xf32> to vector<1x16x8xf32>
    %55 = vector.shape_cast %51 : vector<16x8xf32> to vector<1x16x8xf32>
    %56 = tpu.concatenate %52, %53, %54, %55 in 0 : vector<1x16x8xf32>, vector<1x16x8xf32>, vector<1x16x8xf32>, vector<1x16x8xf32> -> vector<4x16x8xf32>
    %57 = vector.extract_strided_slice %47 {offsets = [0, 32], sizes = [16, 8], strides = [1, 1]} : vector<16x96xf32> to vector<16x8xf32>
    %58 = vector.extract_strided_slice %47 {offsets = [0, 40], sizes = [16, 8], strides = [1, 1]} : vector<16x96xf32> to vector<16x8xf32>
    %59 = vector.extract_strided_slice %47 {offsets = [0, 48], sizes = [16, 8], strides = [1, 1]} : vector<16x96xf32> to vector<16x8xf32>
    %60 = vector.extract_strided_slice %47 {offsets = [0, 56], sizes = [16, 8], strides = [1, 1]} : vector<16x96xf32> to vector<16x8xf32>
    %61 = vector.shape_cast %57 : vector<16x8xf32> to vector<1x16x8xf32>
    %62 = vector.shape_cast %58 : vector<16x8xf32> to vector<1x16x8xf32>
    %63 = vector.shape_cast %59 : vector<16x8xf32> to vector<1x16x8xf32>
    %64 = vector.shape_cast %60 : vector<16x8xf32> to vector<1x16x8xf32>
    %65 = tpu.concatenate %61, %62, %63, %64 in 0 : vector<1x16x8xf32>, vector<1x16x8xf32>, vector<1x16x8xf32>, vector<1x16x8xf32> -> vector<4x16x8xf32>
    %66 = vector.extract_strided_slice %47 {offsets = [0, 64], sizes = [16, 8], strides = [1, 1]} : vector<16x96xf32> to vector<16x8xf32>
    %67 = vector.extract_strided_slice %47 {offsets = [0, 72], sizes = [16, 8], strides = [1, 1]} : vector<16x96xf32> to vector<16x8xf32>
    %68 = vector.extract_strided_slice %47 {offsets = [0, 80], sizes = [16, 8], strides = [1, 1]} : vector<16x96xf32> to vector<16x8xf32>
    %69 = vector.extract_strided_slice %47 {offsets = [0, 88], sizes = [16, 8], strides = [1, 1]} : vector<16x96xf32> to vector<16x8xf32>
    %70 = vector.shape_cast %66 : vector<16x8xf32> to vector<1x16x8xf32>
    %71 = vector.shape_cast %67 : vector<16x8xf32> to vector<1x16x8xf32>
    %72 = vector.shape_cast %68 : vector<16x8xf32> to vector<1x16x8xf32>
    %73 = vector.shape_cast %69 : vector<16x8xf32> to vector<1x16x8xf32>
    %74 = tpu.concatenate %70, %71, %72, %73 in 0 : vector<1x16x8xf32>, vector<1x16x8xf32>, vector<1x16x8xf32>, vector<1x16x8xf32> -> vector<4x16x8xf32>
    "tpu.trace_start"() <{level = 10 : i32, message = "hqd,hkd->hqk"}> : () -> ()
    %cst_23 = arith.constant dense<0.000000e+00> : vector<4x16x16xf32>
    %75 = tpu.matmul %56, %65, %cst_23 {dimension_numbers = #tpu.dot_dimension_numbers<[2], [2], [1], [1], [0, 0, 0, 1, 1, 1], [0], [0]>} : vector<4x16x8xf32>, vector<4x16x8xf32>, vector<4x16x16xf32> -> vector<4x16x16xf32>
    "tpu.trace_stop"() : () -> ()
    %76 = arith.addf %75, %4 : vector<4x16x16xf32>
    %cst_24 = arith.constant dense<0xFF800000> : vector<4x16xf32>
    %77 = vector.multi_reduction <maximumf>, %76, %cst_24 [2] : vector<4x16x16xf32> to vector<4x16xf32>
    %78 = vector.shape_cast %77 : vector<4x16xf32> to vector<4x16x1xf32>
    %79 = vector.broadcast %78 : vector<4x16x1xf32> to vector<4x16x16xf32>
    %80 = arith.subf %76, %79 : vector<4x16x16xf32>
    %81 = math.exp %80 : vector<4x16x16xf32>
    %cst_25 = arith.constant dense<0.000000e+00> : vector<4x16xf32>
    %82 = vector.multi_reduction <add>, %81, %cst_25 [2] : vector<4x16x16xf32> to vector<4x16xf32>
    %83 = vector.shape_cast %82 : vector<4x16xf32> to vector<4x16x1xf32>
    %84 = vector.broadcast %83 : vector<4x16x1xf32> to vector<4x16x16xf32>
    %85 = arith.divf %81, %84 : vector<4x16x16xf32>
    "tpu.trace_start"() <{level = 10 : i32, message = "hqk,hkd->hqd"}> : () -> ()
    %cst_26 = arith.constant dense<0.000000e+00> : vector<4x16x8xf32>
    %86 = tpu.matmul %85, %74, %cst_26 {dimension_numbers = #tpu.dot_dimension_numbers<[2], [1], [1], [2], [0, 0, 0, 1, 1, 2], [0], [0]>} : vector<4x16x16xf32>, vector<4x16x8xf32>, vector<4x16x8xf32> -> vector<4x16x8xf32>
    "tpu.trace_stop"() : () -> ()
    %87 = vector.extract_strided_slice %86 {offsets = [0, 0, 0], sizes = [1, 16, 8], strides = [1, 1, 1]} : vector<4x16x8xf32> to vector<1x16x8xf32>
    %88 = vector.shape_cast %87 : vector<1x16x8xf32> to vector<16x8xf32>
    %89 = vector.extract_strided_slice %86 {offsets = [1, 0, 0], sizes = [1, 16, 8], strides = [1, 1, 1]} : vector<4x16x8xf32> to vector<1x16x8xf32>
    %90 = vector.shape_cast %89 : vector<1x16x8xf32> to vector<16x8xf32>
    %91 = vector.extract_strided_slice %86 {offsets = [2, 0, 0], sizes = [1, 16, 8], strides = [1, 1, 1]} : vector<4x16x8xf32> to vector<1x16x8xf32>
    %92 = vector.shape_cast %91 : vector<1x16x8xf32> to vector<16x8xf32>
    %93 = vector.extract_strided_slice %86 {offsets = [3, 0, 0], sizes = [1, 16, 8], strides = [1, 1, 1]} : vector<4x16x8xf32> to vector<1x16x8xf32>
    %94 = vector.shape_cast %93 : vector<1x16x8xf32> to vector<16x8xf32>
    %95 = tpu.concatenate %88, %90, %92, %94 in 1 : vector<16x8xf32>, vector<16x8xf32>, vector<16x8xf32>, vector<16x8xf32> -> vector<16x32xf32>
    %cst_27 = arith.constant dense<0.000000e+00> : vector<16x32xf32>
    %96 = tpu.matmul %95, %17, %cst_27 {dimension_numbers = #tpu.dot_dimension_numbers<[1], [0], [0], [1], [0, 0, 1, 1], [], []>} : vector<16x32xf32>, vector<32x32xf32>, vector<16x32xf32> -> vector<16x32xf32>
    %97 = arith.addf %0, %96 : vector<16x32xf32>
    %98 = vector.broadcast %11 : vector<1x32xf32> to vector<16x32xf32>
    %99 = arith.addf %97, %98 : vector<16x32xf32>
    %cst_28 = arith.constant dense<0.000000e+00> : vector<16xf32>
    %100 = vector.multi_reduction <add>, %99, %cst_28 [1] : vector<16x32xf32> to vector<16xf32>
    %101 = vector.shape_cast %100 : vector<16xf32> to vector<16x1xf32>
    %cst_29 = arith.constant 3.200000e+01 : f32
    %102 = vector.broadcast %cst_29 : f32 to vector<16x1xf32>
    %103 = arith.divf %101, %102 : vector<16x1xf32>
    %104 = vector.broadcast %103 : vector<16x1xf32> to vector<16x32xf32>
    %105 = arith.subf %99, %104 : vector<16x32xf32>
    %106 = arith.mulf %105, %105 : vector<16x32xf32>
    %cst_30 = arith.constant dense<0.000000e+00> : vector<16xf32>
    %107 = vector.multi_reduction <add>, %106, %cst_30 [1] : vector<16x32xf32> to vector<16xf32>
    %108 = vector.shape_cast %107 : vector<16xf32> to vector<16x1xf32>
    %cst_31 = arith.constant 3.200000e+01 : f32
    %109 = vector.broadcast %cst_31 : f32 to vector<16x1xf32>
    %110 = arith.divf %108, %109 : vector<16x1xf32>
    %111 = vector.broadcast %103 : vector<16x1xf32> to vector<16x32xf32>
    %112 = arith.subf %99, %111 : vector<16x32xf32>
    %cst_32 = arith.constant 9.99999974E-6 : f32
    %113 = vector.broadcast %cst_32 : f32 to vector<16x1xf32>
    %114 = arith.addf %110, %113 : vector<16x1xf32>
    %115 = math.rsqrt %114 : vector<16x1xf32>
    %116 = vector.broadcast %115 : vector<16x1xf32> to vector<16x32xf32>
    %117 = arith.mulf %112, %116 : vector<16x32xf32>
    %118 = vector.broadcast %9 : vector<1x32xf32> to vector<16x32xf32>
    %119 = arith.mulf %117, %118 : vector<16x32xf32>
    %120 = vector.broadcast %10 : vector<1x32xf32> to vector<16x32xf32>
    %121 = arith.addf %119, %120 : vector<16x32xf32>
    %cst_33 = arith.constant dense<0.000000e+00> : vector<16x64xf32>
    %122 = tpu.matmul %121, %19, %cst_33 {dimension_numbers = #tpu.dot_dimension_numbers<[1], [0], [0], [1], [0, 0, 1, 1], [], []>} : vector<16x32xf32>, vector<32x64xf32>, vector<16x64xf32> -> vector<16x64xf32>
    %123 = vector.broadcast %22 : vector<1x64xf32> to vector<16x64xf32>
    %124 = arith.addf %122, %123 : vector<16x64xf32>
    %cst_34 = arith.constant 0.000000e+00 : f32
    %125 = vector.broadcast %cst_34 : f32 to vector<16x64xf32>
    %126 = arith.maximumf %124, %125 : vector<16x64xf32>
    %cst_35 = arith.constant dense<0.000000e+00> : vector<16x32xf32>
    %127 = tpu.matmul %126, %21, %cst_35 {dimension_numbers = #tpu.dot_dimension_numbers<[1], [0], [0], [1], [0, 0, 1, 1], [], []>} : vector<16x64xf32>, vector<64x32xf32>, vector<16x32xf32> -> vector<16x32xf32>
    %128 = arith.addf %99, %127 : vector<16x32xf32>
    %129 = vector.broadcast %12 : vector<1x32xf32> to vector<16x32xf32>
    %130 = arith.addf %128, %129 : vector<16x32xf32>
    %c1 = arith.constant 1 : index
    %c0_36 = arith.constant 0 : index
    %c0_37 = arith.constant 0 : index
    %131 = vector.load %arg6[%c1, %c0_36, %c0_37] : memref<2x8x96xf32, #tpu.memory_space<vmem>>, vector<1x8x96xf32>
    %132 = vector.shape_cast %131 : vector<1x8x96xf32> to vector<8x96xf32>
    %133 = vector.extract_strided_slice %132 {offsets = [0, 0], sizes = [1, 32], strides = [1, 1]} : vector<8x96xf32> to vector<1x32xf32>
    %134 = vector.extract_strided_slice %132 {offsets = [1, 0], sizes = [1, 32], strides = [1, 1]} : vector<8x96xf32> to vector<1x32xf32>
    %135 = vector.extract_strided_slice %132 {offsets = [2, 0], sizes = [1, 32], strides = [1, 1]} : vector<8x96xf32> to vector<1x32xf32>
    %136 = vector.extract_strided_slice %132 {offsets = [3, 0], sizes = [1, 32], strides = [1, 1]} : vector<8x96xf32> to vector<1x32xf32>
    %137 = vector.extract_strided_slice %132 {offsets = [4, 0], sizes = [1, 32], strides = [1, 1]} : vector<8x96xf32> to vector<1x32xf32>
    %138 = vector.extract_strided_slice %132 {offsets = [5, 0], sizes = [1, 32], strides = [1, 1]} : vector<8x96xf32> to vector<1x32xf32>
    %139 = vector.extract_strided_slice %132 {offsets = [6, 0], sizes = [1, 96], strides = [1, 1]} : vector<8x96xf32> to vector<1x96xf32>
    %c1_38 = arith.constant 1 : index
    %c0_39 = arith.constant 0 : index
    %c0_40 = arith.constant 0 : index
    %140 = vector.load %arg2[%c1_38, %c0_39, %c0_40] : memref<2x32x96xf32, #tpu.memory_space<vmem>>, vector<1x32x96xf32>
    %141 = vector.shape_cast %140 : vector<1x32x96xf32> to vector<32x96xf32>
    %c1_41 = arith.constant 1 : index
    %c0_42 = arith.constant 0 : index
    %c0_43 = arith.constant 0 : index
    %142 = vector.load %arg3[%c1_41, %c0_42, %c0_43] : memref<2x32x32xf32, #tpu.memory_space<vmem>>, vector<1x32x32xf32>
    %143 = vector.shape_cast %142 : vector<1x32x32xf32> to vector<32x32xf32>
    %c1_44 = arith.constant 1 : index
    %c0_45 = arith.constant 0 : index
    %c0_46 = arith.constant 0 : index
    %144 = vector.load %arg4[%c1_44, %c0_45, %c0_46] : memref<2x32x64xf32, #tpu.memory_space<vmem>>, vector<1x32x64xf32>
    %145 = vector.shape_cast %144 : vector<1x32x64xf32> to vector<32x64xf32>
    %c1_47 = arith.constant 1 : index
    %c0_48 = arith.constant 0 : index
    %c0_49 = arith.constant 0 : index
    %146 = vector.load %arg5[%c1_47, %c0_48, %c0_49] : memref<2x64x32xf32, #tpu.memory_space<vmem>>, vector<1x64x32xf32>
    %147 = vector.shape_cast %146 : vector<1x64x32xf32> to vector<64x32xf32>
    %148 = vector.extract_strided_slice %132 {offsets = [7, 0], sizes = [1, 64], strides = [1, 1]} : vector<8x96xf32> to vector<1x64xf32>
    %cst_50 = arith.constant dense<0.000000e+00> : vector<16xf32>
    %149 = vector.multi_reduction <add>, %130, %cst_50 [1] : vector<16x32xf32> to vector<16xf32>
    %150 = vector.shape_cast %149 : vector<16xf32> to vector<16x1xf32>
    %cst_51 = arith.constant 3.200000e+01 : f32
    %151 = vector.broadcast %cst_51 : f32 to vector<16x1xf32>
    %152 = arith.divf %150, %151 : vector<16x1xf32>
    %153 = vector.broadcast %152 : vector<16x1xf32> to vector<16x32xf32>
    %154 = arith.subf %130, %153 : vector<16x32xf32>
    %155 = arith.mulf %154, %154 : vector<16x32xf32>
    %cst_52 = arith.constant dense<0.000000e+00> : vector<16xf32>
    %156 = vector.multi_reduction <add>, %155, %cst_52 [1] : vector<16x32xf32> to vector<16xf32>
    %157 = vector.shape_cast %156 : vector<16xf32> to vector<16x1xf32>
    %cst_53 = arith.constant 3.200000e+01 : f32
    %158 = vector.broadcast %cst_53 : f32 to vector<16x1xf32>
    %159 = arith.divf %157, %158 : vector<16x1xf32>
    %160 = vector.broadcast %152 : vector<16x1xf32> to vector<16x32xf32>
    %161 = arith.subf %130, %160 : vector<16x32xf32>
    %cst_54 = arith.constant 9.99999974E-6 : f32
    %162 = vector.broadcast %cst_54 : f32 to vector<16x1xf32>
    %163 = arith.addf %159, %162 : vector<16x1xf32>
    %164 = math.rsqrt %163 : vector<16x1xf32>
    %165 = vector.broadcast %164 : vector<16x1xf32> to vector<16x32xf32>
    %166 = arith.mulf %161, %165 : vector<16x32xf32>
    %167 = vector.broadcast %133 : vector<1x32xf32> to vector<16x32xf32>
    %168 = arith.mulf %166, %167 : vector<16x32xf32>
    %169 = vector.broadcast %134 : vector<1x32xf32> to vector<16x32xf32>
    %170 = arith.addf %168, %169 : vector<16x32xf32>
    %cst_55 = arith.constant dense<0.000000e+00> : vector<16x96xf32>
    %171 = tpu.matmul %170, %141, %cst_55 {dimension_numbers = #tpu.dot_dimension_numbers<[1], [0], [0], [1], [0, 0, 1, 1], [], []>} : vector<16x32xf32>, vector<32x96xf32>, vector<16x96xf32> -> vector<16x96xf32>
    %172 = vector.broadcast %139 : vector<1x96xf32> to vector<16x96xf32>
    %173 = arith.addf %171, %172 : vector<16x96xf32>
    %174 = vector.extract_strided_slice %173 {offsets = [0, 0], sizes = [16, 8], strides = [1, 1]} : vector<16x96xf32> to vector<16x8xf32>
    %175 = vector.extract_strided_slice %173 {offsets = [0, 8], sizes = [16, 8], strides = [1, 1]} : vector<16x96xf32> to vector<16x8xf32>
    %176 = vector.extract_strided_slice %173 {offsets = [0, 16], sizes = [16, 8], strides = [1, 1]} : vector<16x96xf32> to vector<16x8xf32>
    %177 = vector.extract_strided_slice %173 {offsets = [0, 24], sizes = [16, 8], strides = [1, 1]} : vector<16x96xf32> to vector<16x8xf32>
    %178 = vector.shape_cast %174 : vector<16x8xf32> to vector<1x16x8xf32>
    %179 = vector.shape_cast %175 : vector<16x8xf32> to vector<1x16x8xf32>
    %180 = vector.shape_cast %176 : vector<16x8xf32> to vector<1x16x8xf32>
    %181 = vector.shape_cast %177 : vector<16x8xf32> to vector<1x16x8xf32>
    %182 = tpu.concatenate %178, %179, %180, %181 in 0 : vector<1x16x8xf32>, vector<1x16x8xf32>, vector<1x16x8xf32>, vector<1x16x8xf32> -> vector<4x16x8xf32>
    %183 = vector.extract_strided_slice %173 {offsets = [0, 32], sizes = [16, 8], strides = [1, 1]} : vector<16x96xf32> to vector<16x8xf32>
    %184 = vector.extract_strided_slice %173 {offsets = [0, 40], sizes = [16, 8], strides = [1, 1]} : vector<16x96xf32> to vector<16x8xf32>
    %185 = vector.extract_strided_slice %173 {offsets = [0, 48], sizes = [16, 8], strides = [1, 1]} : vector<16x96xf32> to vector<16x8xf32>
    %186 = vector.extract_strided_slice %173 {offsets = [0, 56], sizes = [16, 8], strides = [1, 1]} : vector<16x96xf32> to vector<16x8xf32>
    %187 = vector.shape_cast %183 : vector<16x8xf32> to vector<1x16x8xf32>
    %188 = vector.shape_cast %184 : vector<16x8xf32> to vector<1x16x8xf32>
    %189 = vector.shape_cast %185 : vector<16x8xf32> to vector<1x16x8xf32>
    %190 = vector.shape_cast %186 : vector<16x8xf32> to vector<1x16x8xf32>
    %191 = tpu.concatenate %187, %188, %189, %190 in 0 : vector<1x16x8xf32>, vector<1x16x8xf32>, vector<1x16x8xf32>, vector<1x16x8xf32> -> vector<4x16x8xf32>
    %192 = vector.extract_strided_slice %173 {offsets = [0, 64], sizes = [16, 8], strides = [1, 1]} : vector<16x96xf32> to vector<16x8xf32>
    %193 = vector.extract_strided_slice %173 {offsets = [0, 72], sizes = [16, 8], strides = [1, 1]} : vector<16x96xf32> to vector<16x8xf32>
    %194 = vector.extract_strided_slice %173 {offsets = [0, 80], sizes = [16, 8], strides = [1, 1]} : vector<16x96xf32> to vector<16x8xf32>
    %195 = vector.extract_strided_slice %173 {offsets = [0, 88], sizes = [16, 8], strides = [1, 1]} : vector<16x96xf32> to vector<16x8xf32>
    %196 = vector.shape_cast %192 : vector<16x8xf32> to vector<1x16x8xf32>
    %197 = vector.shape_cast %193 : vector<16x8xf32> to vector<1x16x8xf32>
    %198 = vector.shape_cast %194 : vector<16x8xf32> to vector<1x16x8xf32>
    %199 = vector.shape_cast %195 : vector<16x8xf32> to vector<1x16x8xf32>
    %200 = tpu.concatenate %196, %197, %198, %199 in 0 : vector<1x16x8xf32>, vector<1x16x8xf32>, vector<1x16x8xf32>, vector<1x16x8xf32> -> vector<4x16x8xf32>
    "tpu.trace_start"() <{level = 10 : i32, message = "hqd,hkd->hqk"}> : () -> ()
    %cst_56 = arith.constant dense<0.000000e+00> : vector<4x16x16xf32>
    %201 = tpu.matmul %182, %191, %cst_56 {dimension_numbers = #tpu.dot_dimension_numbers<[2], [2], [1], [1], [0, 0, 0, 1, 1, 1], [0], [0]>} : vector<4x16x8xf32>, vector<4x16x8xf32>, vector<4x16x16xf32> -> vector<4x16x16xf32>
    "tpu.trace_stop"() : () -> ()
    %202 = arith.addf %201, %4 : vector<4x16x16xf32>
    %cst_57 = arith.constant dense<0xFF800000> : vector<4x16xf32>
    %203 = vector.multi_reduction <maximumf>, %202, %cst_57 [2] : vector<4x16x16xf32> to vector<4x16xf32>
    %204 = vector.shape_cast %203 : vector<4x16xf32> to vector<4x16x1xf32>
    %205 = vector.broadcast %204 : vector<4x16x1xf32> to vector<4x16x16xf32>
    %206 = arith.subf %202, %205 : vector<4x16x16xf32>
    %207 = math.exp %206 : vector<4x16x16xf32>
    %cst_58 = arith.constant dense<0.000000e+00> : vector<4x16xf32>
    %208 = vector.multi_reduction <add>, %207, %cst_58 [2] : vector<4x16x16xf32> to vector<4x16xf32>
    %209 = vector.shape_cast %208 : vector<4x16xf32> to vector<4x16x1xf32>
    %210 = vector.broadcast %209 : vector<4x16x1xf32> to vector<4x16x16xf32>
    %211 = arith.divf %207, %210 : vector<4x16x16xf32>
    "tpu.trace_start"() <{level = 10 : i32, message = "hqk,hkd->hqd"}> : () -> ()
    %cst_59 = arith.constant dense<0.000000e+00> : vector<4x16x8xf32>
    %212 = tpu.matmul %211, %200, %cst_59 {dimension_numbers = #tpu.dot_dimension_numbers<[2], [1], [1], [2], [0, 0, 0, 1, 1, 2], [0], [0]>} : vector<4x16x16xf32>, vector<4x16x8xf32>, vector<4x16x8xf32> -> vector<4x16x8xf32>
    "tpu.trace_stop"() : () -> ()
    %213 = vector.extract_strided_slice %212 {offsets = [0, 0, 0], sizes = [1, 16, 8], strides = [1, 1, 1]} : vector<4x16x8xf32> to vector<1x16x8xf32>
    %214 = vector.shape_cast %213 : vector<1x16x8xf32> to vector<16x8xf32>
    %215 = vector.extract_strided_slice %212 {offsets = [1, 0, 0], sizes = [1, 16, 8], strides = [1, 1, 1]} : vector<4x16x8xf32> to vector<1x16x8xf32>
    %216 = vector.shape_cast %215 : vector<1x16x8xf32> to vector<16x8xf32>
    %217 = vector.extract_strided_slice %212 {offsets = [2, 0, 0], sizes = [1, 16, 8], strides = [1, 1, 1]} : vector<4x16x8xf32> to vector<1x16x8xf32>
    %218 = vector.shape_cast %217 : vector<1x16x8xf32> to vector<16x8xf32>
    %219 = vector.extract_strided_slice %212 {offsets = [3, 0, 0], sizes = [1, 16, 8], strides = [1, 1, 1]} : vector<4x16x8xf32> to vector<1x16x8xf32>
    %220 = vector.shape_cast %219 : vector<1x16x8xf32> to vector<16x8xf32>
    %221 = tpu.concatenate %214, %216, %218, %220 in 1 : vector<16x8xf32>, vector<16x8xf32>, vector<16x8xf32>, vector<16x8xf32> -> vector<16x32xf32>
    %cst_60 = arith.constant dense<0.000000e+00> : vector<16x32xf32>
    %222 = tpu.matmul %221, %143, %cst_60 {dimension_numbers = #tpu.dot_dimension_numbers<[1], [0], [0], [1], [0, 0, 1, 1], [], []>} : vector<16x32xf32>, vector<32x32xf32>, vector<16x32xf32> -> vector<16x32xf32>
    %223 = arith.addf %130, %222 : vector<16x32xf32>
    %224 = vector.broadcast %137 : vector<1x32xf32> to vector<16x32xf32>
    %225 = arith.addf %223, %224 : vector<16x32xf32>
    %cst_61 = arith.constant dense<0.000000e+00> : vector<16xf32>
    %226 = vector.multi_reduction <add>, %225, %cst_61 [1] : vector<16x32xf32> to vector<16xf32>
    %227 = vector.shape_cast %226 : vector<16xf32> to vector<16x1xf32>
    %cst_62 = arith.constant 3.200000e+01 : f32
    %228 = vector.broadcast %cst_62 : f32 to vector<16x1xf32>
    %229 = arith.divf %227, %228 : vector<16x1xf32>
    %230 = vector.broadcast %229 : vector<16x1xf32> to vector<16x32xf32>
    %231 = arith.subf %225, %230 : vector<16x32xf32>
    %232 = arith.mulf %231, %231 : vector<16x32xf32>
    %cst_63 = arith.constant dense<0.000000e+00> : vector<16xf32>
    %233 = vector.multi_reduction <add>, %232, %cst_63 [1] : vector<16x32xf32> to vector<16xf32>
    %234 = vector.shape_cast %233 : vector<16xf32> to vector<16x1xf32>
    %cst_64 = arith.constant 3.200000e+01 : f32
    %235 = vector.broadcast %cst_64 : f32 to vector<16x1xf32>
    %236 = arith.divf %234, %235 : vector<16x1xf32>
    %237 = vector.broadcast %229 : vector<16x1xf32> to vector<16x32xf32>
    %238 = arith.subf %225, %237 : vector<16x32xf32>
    %cst_65 = arith.constant 9.99999974E-6 : f32
    %239 = vector.broadcast %cst_65 : f32 to vector<16x1xf32>
    %240 = arith.addf %236, %239 : vector<16x1xf32>
    %241 = math.rsqrt %240 : vector<16x1xf32>
    %242 = vector.broadcast %241 : vector<16x1xf32> to vector<16x32xf32>
    %243 = arith.mulf %238, %242 : vector<16x32xf32>
    %244 = vector.broadcast %135 : vector<1x32xf32> to vector<16x32xf32>
    %245 = arith.mulf %243, %244 : vector<16x32xf32>
    %246 = vector.broadcast %136 : vector<1x32xf32> to vector<16x32xf32>
    %247 = arith.addf %245, %246 : vector<16x32xf32>
    %cst_66 = arith.constant dense<0.000000e+00> : vector<16x64xf32>
    %248 = tpu.matmul %247, %145, %cst_66 {dimension_numbers = #tpu.dot_dimension_numbers<[1], [0], [0], [1], [0, 0, 1, 1], [], []>} : vector<16x32xf32>, vector<32x64xf32>, vector<16x64xf32> -> vector<16x64xf32>
    %249 = vector.broadcast %148 : vector<1x64xf32> to vector<16x64xf32>
    %250 = arith.addf %248, %249 : vector<16x64xf32>
    %cst_67 = arith.constant 0.000000e+00 : f32
    %251 = vector.broadcast %cst_67 : f32 to vector<16x64xf32>
    %252 = arith.maximumf %250, %251 : vector<16x64xf32>
    %cst_68 = arith.constant dense<0.000000e+00> : vector<16x32xf32>
    %253 = tpu.matmul %252, %147, %cst_68 {dimension_numbers = #tpu.dot_dimension_numbers<[1], [0], [0], [1], [0, 0, 1, 1], [], []>} : vector<16x64xf32>, vector<64x32xf32>, vector<16x32xf32> -> vector<16x32xf32>
    %254 = arith.addf %225, %253 : vector<16x32xf32>
    %255 = vector.broadcast %138 : vector<1x32xf32> to vector<16x32xf32>
    %256 = arith.addf %254, %255 : vector<16x32xf32>
    %c0_69 = arith.constant 0 : index
    %c0_70 = arith.constant 0 : index
    %257 = vector.load %arg7[%c0_69, %c0_70] : memref<2x32xf32, #tpu.memory_space<vmem>>, vector<1x32xf32>
    %c1_71 = arith.constant 1 : index
    %c0_72 = arith.constant 0 : index
    %258 = vector.load %arg7[%c1_71, %c0_72] : memref<2x32xf32, #tpu.memory_space<vmem>>, vector<1x32xf32>
    %cst_73 = arith.constant dense<0.000000e+00> : vector<16xf32>
    %259 = vector.multi_reduction <add>, %256, %cst_73 [1] : vector<16x32xf32> to vector<16xf32>
    %260 = vector.shape_cast %259 : vector<16xf32> to vector<16x1xf32>
    %cst_74 = arith.constant 3.200000e+01 : f32
    %261 = vector.broadcast %cst_74 : f32 to vector<16x1xf32>
    %262 = arith.divf %260, %261 : vector<16x1xf32>
    %263 = vector.broadcast %262 : vector<16x1xf32> to vector<16x32xf32>
    %264 = arith.subf %256, %263 : vector<16x32xf32>
    %265 = arith.mulf %264, %264 : vector<16x32xf32>
    %cst_75 = arith.constant dense<0.000000e+00> : vector<16xf32>
    %266 = vector.multi_reduction <add>, %265, %cst_75 [1] : vector<16x32xf32> to vector<16xf32>
    %267 = vector.shape_cast %266 : vector<16xf32> to vector<16x1xf32>
    %cst_76 = arith.constant 3.200000e+01 : f32
    %268 = vector.broadcast %cst_76 : f32 to vector<16x1xf32>
    %269 = arith.divf %267, %268 : vector<16x1xf32>
    %270 = vector.broadcast %262 : vector<16x1xf32> to vector<16x32xf32>
    %271 = arith.subf %256, %270 : vector<16x32xf32>
    %cst_77 = arith.constant 9.99999974E-6 : f32
    %272 = vector.broadcast %cst_77 : f32 to vector<16x1xf32>
    %273 = arith.addf %269, %272 : vector<16x1xf32>
    %274 = math.rsqrt %273 : vector<16x1xf32>
    %275 = vector.broadcast %274 : vector<16x1xf32> to vector<16x32xf32>
    %276 = arith.mulf %271, %275 : vector<16x32xf32>
    %277 = vector.broadcast %257 : vector<1x32xf32> to vector<16x32xf32>
    %278 = arith.mulf %276, %277 : vector<16x32xf32>
    %279 = vector.broadcast %258 : vector<1x32xf32> to vector<16x32xf32>
    %280 = arith.addf %278, %279 : vector<16x32xf32>
    %c0_78 = arith.constant 0 : index
    %c0_79 = arith.constant 0 : index
    %281 = vector.load %arg8[%c0_78, %c0_79] : memref<16x32xf32, #tpu.memory_space<vmem>>, vector<16x32xf32>
    tpu.vector_store %arg8[%c0_78, %c0_79], %280 {strides = array<i32>} : memref<16x32xf32, #tpu.memory_space<vmem>>, vector<16x32xf32>,
    return
  }
}

</mosaic_0001>

<bundles_post_ra>
// kernel: tpu_custom_call.1
= control target key start
LH: loop header
LB: loop body
LE: loop exit
PB: predicated region body
PF: predicated region fallthrough
CT: control target
= control target key end

     0   :  { %13 = vsyncpa [#allocation3], 0  ;;  %s2793_s0 = inlined_call_operand.hbm [shape: f32[16,32], index: 0, kind: input, shape index: {}]   ;;  %s2794_s1 = inlined_call_operand.hbm [shape: f32[16,16], index: 1, kind: input, shape index: {}]   ;;  %s2795_s2 = inlined_call_operand.vmem [shape: f32[2,32,96], index: 2, kind: input, shape index: {}]   ;;  %s2796_s3 = inlined_call_operand.vmem [shape: f32[2,32,32], index: 3, kind: input, shape index: {}]   ;;  %s2797_s4 = inlined_call_operand.vmem [shape: f32[2,32,64], index: 4, kind: input, shape index: {}]   ;;  %s2798_s5 = inlined_call_operand.vmem [shape: f32[2,64,32], index: 5, kind: input, shape index: {}]   ;;  %s2799_s6 = inlined_call_operand.hbm [shape: f32[2,8,96], index: 6, kind: input, shape index: {}]   ;;  %s2800_s7 = inlined_call_operand.vmem [shape: f32[2,32], index: 7, kind: input, shape index: {}]   ;;  %s2801_s8 = inlined_call_operand.hbm [shape: f32[16,32], index: 8, kind: output, shape index: {}]  }
   0x1   :  { %14 = vsyncpa [#allocation6], 0 }
   0x2   :  { %15 = vsyncpa [#allocation4], 0  ;;  %s33_s29 = sshll.u32 %s2794_s1, 4  ;;  %s2036_s30 = smov [#allocation5]   ;;  %s34_s29 = int_to_ptr.hbm [resolvable:$true] %s33_s29 }
   0x3   :  { %s35_s9 = sshll.u32 %s2036_s30, 4  ;;  %s20_s12 = sshll.u32 %s2793_s0, 4  ;;  %s36_s9 = int_to_ptr.vmem [resolvable:$true] %s35_s9  ;;  %s21_s12 = int_to_ptr.hbm [resolvable:$true] %s20_s12 }
   0x4   :  { %s2037_s13 = smov 128   ;;  %s2038_s14 = smov 8  }
   0x5   :  { %41 = dma.hbm_to_vmem [thread:$0]  %s34_s29, 256, %s36_s9, [#allocation6], %s2037_s13, %s2037_s13, %s2038_s14  }
   0x6   :  { %s2039_s15 = smov [#allocation2]   ;;  %s54_s1 = sshll.u32 %s2799_s6, 4  ;;  %s55_s1 = int_to_ptr.hbm [resolvable:$true] %s54_s1 }
   0x7   :  { %s22_s16 = sshll.u32 %s2039_s15, 4  ;;  %s2040_s0 = smov [#allocation7]   ;;  %s23_s16 = int_to_ptr.vmem [resolvable:$true] %s22_s16 }
   0x8   :  { %28 = dma.hbm_to_vmem [thread:$0]  %s21_s12, 256, %s23_s16, [#allocation3], %s2037_s13, %s2037_s13, %s2038_s14  }
   0x9   :  { %s56_s19 = sshll.u32 %s2040_s0, 4  ;;  %s57_s19 = int_to_ptr.vmem [resolvable:$true] %s56_s19 }
   0xa   :  { %62 = dma.hbm_to_vmem [thread:$0]  %s55_s1, 256, %s57_s19, [#allocation6], %s2037_s13, %s2037_s13, %s2038_s14  }
   0xb   :  { %2030 = dma.done.wait [#allocation3], 256  }
   0xc   :  { %2031 = vsyncadd [#allocation3], 4294967040 }
   0xd   :  { %2032 = dma.done.wait [#allocation6], 512  }
   0xe   :  { %2033 = vsyncadd [#allocation6], 4294966784  ;;  %vm102_vm0 = vcmask 261120   ;;  %v2113_v0 = vld [vmem:[#allocation2] sm:$0xff]  ;;  %v2117_v2 = vld [vmem:[#allocation2 + $0x8] sm:$0xff]  ;;  %v2041_v4 = vmov 32.0  }
   0xf   :  { %v103_v1 = vsel %vm102_vm0, %v2113_v0, 0.0  ;;  %v106_v3 = vsel %vm102_vm0, %v2117_v2, 0.0  ;;  %1846 = vrcp.f32 %v2041_v4  ;;  %v85_v21 = vld [vmem:[%s2795_s2 + $0x18] sm:$0xff]  ;;  %v84_v22 = vld [vmem:[%s2795_s2 + $0x10] sm:$0xff]  ;;  %v83_v23 = vld [vmem:[%s2795_s2 + $0x8] sm:$0xff]  ;;  %s2042_s27 = smov 120  }
  0x10   :  { %104 = vadd.xlane.f32.xlu0 %v103_v1  ;;  %179 = vmatpush.msra.mxu0 %v85_v21  ;;  %v82_v24 = vld [vmem:[%s2795_s2] sm:$0xff]  ;;  %s2043_s28 = smov 112   ;;  %s2044_s29 = smov 104   ;;  %vm208_vm8 = vcmask 64512   ;;  %vm345_vm9 = vcmask 130048  }
  0x11   :  { %v2143_v36 = vld [vmem:[#allocation7] sm:$0xff]  ;;  %s2045_s30 = smov 96   ;;  %s2046_s9 = smov 64  }
  0x12   :  { %180 = vmatpush.msra.mxu0 %v84_v22  ;;  %v154_v40 = vperm.slane %v2143_v36, 0  ;;  %v157_v44 = vperm.slane %v2143_v36, 1  ;;  %v160_v54 = vperm.slane %v2143_v36, 6  ;;  %s2047_s10 = smov 24   ;;  %s2048_s11 = smov 16  }
  0x13   :  { %s1692_s22 = sshll.u32 %s2801_s8, 4  ;;  %s1693_s22 = int_to_ptr.hbm [resolvable:$true] %s1692_s22 }
  0x14   :  { %181 = vmatpush.msra.mxu0 %v83_v23 }
  0x15   :  { %v1847_v5 = vpop.eup %1846 }
  0x16   :  { %v110_v6 = vmul.f32 32.0, %v1847_v5  ;;  %vm114_vm1 = vweird.f32 %v1847_v5  ;;  %182 = vmatpush.msra.mxu0 %v82_v24 }
  0x18   :  { %107 = vadd.xlane.f32.xlu0 %v106_v3  ;;  %v111_v7 = vsub.f32 1.0, %v110_v6 }
  0x1a   :  { %v112_v8 = vmul.f32 %v1847_v5, %v111_v7 }
  0x1c   :  { %v113_v9 = vadd.f32 %v1847_v5, %v112_v8 }
  0x1e   :  { %v2121_v10 = vsel %vm114_vm1, %v1847_v5, %v113_v9 }
  0x83   :  { %v105_v11 = vpop.xlane.xlu0 %104 }
  0x84   :  { %v116_v12 = vmul.f32 %v2121_v10, %v105_v11 }
  0x86   :  { %v118_v13 = vsub.f32 %v2113_v0, %v116_v12  ;;  %v79_v12 = vld [vmem:[#allocation5] sm:$0xff] }
  0x88   :  { %v120_v14 = vmul.f32 %v118_v13, %v118_v13 }
  0x8a   :  { %v122_v15 = vsel %vm102_vm0, %v120_v14, 0.0 }
  0x8b   :  { %123 = vadd.xlane.f32.xlu1 %v122_v15  ;;  %v108_v16 = vpop.xlane.xlu0 %107 }
  0x8c   :  { %v117_v17 = vmul.f32 %v2121_v10, %v108_v16  ;;  %v80_v16 = vld [vmem:[#allocation5 + $0x8] sm:$0xff] }
  0x8e   :  { %v119_v18 = vsub.f32 %v2117_v2, %v117_v17 }
  0x90   :  { %v121_v19 = vmul.f32 %v119_v18, %v119_v18 }
  0x92   :  { %v125_v20 = vsel %vm102_vm0, %v121_v19, 0.0 }
  0x93   :  { %126 = vadd.xlane.f32.xlu1 %v125_v20 }
  0xfe   :  { %v124_v25 = vpop.xlane.xlu1 %123 }
  0xff   :  { %v128_v26 = vmul.f32 %v124_v25, %v2121_v10 }
 0x101   :  { %v130_v27 = vadd.f32 1e-05, %v128_v26 }
 0x103   :  { %1848 = vrsqrt.f32 %v130_v27  ;;  %vm138_vm3 = vweird.f32 %v130_v27 }
 0x106   :  { %v127_v28 = vpop.xlane.xlu1 %126 }
 0x107   :  { %v129_v29 = vmul.f32 %v127_v28, %v2121_v10 }
 0x109   :  { %v1849_v30 = vpop.eup %1848  ;;  %v131_v31 = vadd.f32 1e-05, %v129_v29 }
 0x10a   :  { %v133_v32 = vmul.f32 %v1849_v30, %v130_v27  ;;  %vm139_vm2 = vweird.f32 %v1849_v30 }
 0x10b   :  { %1850 = vrsqrt.f32 %v131_v31  ;;  %vm140_vm4 = vmor %vm138_vm3, %vm139_vm2  ;;  %vm148_vm6 = vweird.f32 %v131_v31 }
 0x10c   :  { %v134_v33 = vmul.f32 %v1849_v30, %v133_v32 }
 0x10e   :  { %v135_v34 = vmul.f32 0.5, %v134_v33 }
 0x110   :  { %v136_v35 = vsub.f32 1.5, %v135_v34 }
 0x111   :  { %v1851_v37 = vpop.eup %1850 }
 0x112   :  { %v137_v38 = vmul.f32 %v1849_v30, %v136_v35  ;;  %v143_v39 = vmul.f32 %v1851_v37, %v131_v31  ;;  %vm149_vm5 = vweird.f32 %v1851_v37 }
 0x113   :  { %vm150_vm7 = vmor %vm148_vm6, %vm149_vm5 }
 0x114   :  { %v141_v41 = vsel %vm140_vm4, %v1849_v30, %v137_v38  ;;  %v144_v42 = vmul.f32 %v1851_v37, %v143_v39 }
 0x115   :  { %v152_v43 = vmul.f32 %v141_v41, %v118_v13 }
 0x116   :  { %v145_v45 = vmul.f32 0.5, %v144_v42 }
 0x117   :  { %v155_v46 = vmul.f32 %v154_v40, %v152_v43 }
 0x118   :  { %v146_v47 = vsub.f32 1.5, %v145_v45 }
 0x119   :  { %v158_v48 = vadd.f32 %v157_v44, %v155_v46 }
 0x11a   :  { %v147_v49 = vmul.f32 %v1851_v37, %v146_v47 }
 0x11b   :  { %1706 = vmatmul.msk.f32.vlgmr.msra.gmra.mxu0 %vm102_vm0, %v158_v48 }
 0x11c   :  { %v151_v50 = vsel %vm150_vm7, %v1851_v37, %v147_v49 }
 0x11d   :  { %v153_v51 = vmul.f32 %v151_v50, %v119_v18 }
 0x11f   :  { %v156_v52 = vmul.f32 %v154_v40, %v153_v51 }
 0x121   :  { %v159_v53 = vadd.f32 %v157_v44, %v156_v52 }
 0x123   :  { %1707 = vmatmul.msk.f32.gmra.mxu0 %vm102_vm0, %v159_v53 }
 0x198   :  { %v184_v55 = vpop.f32.mrf.mxu0 }
 0x199   :  { %v2150_v56 = vadd.f32 %v184_v55, %v160_v54 }
 0x19b   :  { %192 = vrot.lane.b32.xlu0 %v2150_v56, %s2042_s27  ;;  %196 = vrot.lane.b32.xlu1 %v2150_v56, %s2043_s28 }
 0x1a0   :  { %v187_v57 = vpop.f32.mrf.mxu0 }
 0x1a1   :  { %v2156_v58 = vadd.f32 %v187_v57, %v160_v54 }
 0x1a3   :  { %194 = vrot.lane.b32.xlu2 %v2156_v58, %s2042_s27 }
 0x1ab   :  { %198 = vrot.lane.b32.xlu2 %v2156_v58, %s2043_s28 }
 0x1b3   :  { %202 = vrot.lane.b32.xlu2 %v2156_v58, %s2044_s29 }
 0x1bb   :  { %200 = vrot.lane.b32.xlu2 %v2150_v56, %s2044_s29 }
 0x1fd   :  { %v2166_v59 = vpop.permute.xlu2 %194 }
 0x1fe   :  { %242 = vrot.lane.b32.xlu2 %v2166_v59, %s2045_s30 }
 0x205   :  { %v2170_v60 = vpop.permute.xlu2 %198 }
 0x206   :  { %277 = vrot.lane.b32.xlu0 %v2170_v60, %s2045_s30 }
 0x20d   :  { %v2174_v61 = vpop.permute.xlu2 %202  ;;  %v2176_v62 = vpop.permute.xlu1 %196 }
 0x20e   :  { %v2178_v63 = vpop.permute.xlu0 %192  ;;  %312 = vrot.lane.b32.xlu0 %v2174_v61, %s2045_s30  ;;  %275 = vrot.lane.b32.xlu1 %v2176_v62, %s2045_s30 }
 0x20f   :  { %240 = vrot.lane.b32.xlu2 %v2178_v63, %s2045_s30 }
 0x215   :  { %v2186_v1 = vpop.permute.xlu2 %200 }
 0x216   :  { %204 = vrot.lane.b32.xlu0 %v2150_v56, %s2045_s30  ;;  %206 = vrot.lane.b32.xlu1 %v2156_v58, %s2045_s30 }
 0x217   :  { %310 = vrot.lane.b32.xlu2 %v2186_v1, %s2045_s30 }
 0x258   :  { %v243_v3 = vpop.permute.xlu2 %242 }
 0x259   :  { %1712 = vmatpush.xpose.msk.msra.mxu2 %vm208_vm8, %v243_v3 }
 0x269   :  { %v241_v4 = vpop.permute.xlu2 %240 }
 0x26a   :  { %1713 = vmatpush.xpose.msk.msra.mxu2 %vm208_vm8, %v241_v4 }
 0x26d   :  { %1714 = vmatmul.msk.f32.vlgmr.msra.gmra.mxu2 %vm208_vm8, %v2178_v63 }
 0x271   :  { %v311_v8 = vpop.permute.xlu2 %310 }
 0x275   :  { %1715 = vmatmul.msk.f32.gmra.mxu2 %vm208_vm8, %v2166_v59 }
 0x278   :  { %v278_v5 = vpop.permute.xlu0 %277 }
 0x279   :  { %1716 = vmatpush.xpose.msk.msra.mxu3 %vm208_vm8, %v278_v5 }
 0x280   :  { %v276_v6 = vpop.permute.xlu1 %275  ;;  %v313_v7 = vpop.permute.xlu0 %312 }
 0x281   :  { %1717 = vmatpush.xpose.msk.msra.mxu3 %vm208_vm8, %v276_v6  ;;  %1720 = vmatpush.xpose.msk.msrb.mxu0 %vm208_vm8, %v313_v7 }
 0x284   :  { %1718 = vmatmul.msk.f32.vlgmr.msra.gmra.mxu3 %vm208_vm8, %v2176_v62 }
 0x285   :  { %1721 = vmatpush.xpose.msk.msrb.mxu0 %vm208_vm8, %v311_v8 }
 0x288   :  { %v207_v9 = vpop.permute.xlu1 %206  ;;  %1722 = vmatmul.msk.f32.vlgmr.msrb.gmra.mxu0 %vm208_vm8, %v2186_v1  ;;  %v205_v11 = vpop.permute.xlu0 %204 }
 0x289   :  { %1708 = vmatpush.xpose.msk.msra.mxu1 %vm208_vm8, %v207_v9 }
 0x28c   :  { %1719 = vmatmul.msk.f32.gmra.mxu3 %vm208_vm8, %v2170_v60 }
 0x28d   :  { %1709 = vmatpush.xpose.msk.msra.mxu1 %vm208_vm8, %v205_v11 }
 0x290   :  { %1710 = vmatmul.msk.f32.vlgmr.msra.gmra.mxu1 %vm208_vm8, %v2150_v56  ;;  %1723 = vmatmul.msk.f32.gmra.mxu0 %vm208_vm8, %v2174_v61 }
 0x298   :  { %1711 = vmatmul.msk.f32.gmra.mxu1 %vm208_vm8, %v2156_v58 }
 0x2f0   :  { %v269_v13 = vpop.f32.mrf.mxu2 }
 0x2f1   :  { %v270_v14 = vadd.f32 %v269_v13, %v79_v12 }
 0x2f3   :  { %v352_v15 = vsel %vm345_vm9, %v270_v14, -inf }
 0x2f4   :  { %353 = vmax.xlane.f32.xlu2 %v352_v15 }
 0x2f8   :  { %v272_v17 = vpop.f32.mrf.mxu2 }
 0x2f9   :  { %v273_v18 = vadd.f32 %v272_v17, %v80_v16  ;;  %v1809_v17 = vpack.i.bf16 %v2176_v62, %v2178_v63 }
 0x2fb   :  { %v355_v19 = vsel %vm345_vm9, %v273_v18, -inf }
 0x2fc   :  { %356 = vmax.xlane.f32.xlu0 %v355_v19 }
 0x305   :  { %v339_v20 = vpop.f32.mrf.mxu0 }
 0x306   :  { %v340_v21 = vadd.f32 %v339_v20, %v79_v12 }
 0x307   :  { %v304_v22 = vpop.f32.mrf.mxu3 }
 0x308   :  { %v305_v23 = vadd.f32 %v304_v22, %v79_v12  ;;  %v364_v24 = vsel %vm345_vm9, %v340_v21, -inf }
 0x309   :  { %365 = vmax.xlane.f32.xlu2 %v364_v24 }
 0x30a   :  { %v358_v25 = vsel %vm345_vm9, %v305_v23, -inf }
 0x30b   :  { %359 = vmax.xlane.f32.xlu1 %v358_v25 }
 0x30d   :  { %v234_v26 = vpop.f32.mrf.mxu1  ;;  %v342_v27 = vpop.f32.mrf.mxu0 }
 0x30e   :  { %v2222_v28 = vadd.f32 %v234_v26, %v79_v12  ;;  %v343_v29 = vadd.f32 %v342_v27, %v80_v16 }
 0x30f   :  { %v307_v30 = vpop.f32.mrf.mxu3 }
 0x310   :  { %v308_v31 = vadd.f32 %v307_v30, %v80_v16  ;;  %v367_v32 = vsel %vm345_vm9, %v343_v29, -inf  ;;  %v346_v33 = vsel %vm345_vm9, %v2222_v28, -inf }
 0x311   :  { %368 = vmax.xlane.f32.xlu0 %v367_v32  ;;  %347 = vmax.xlane.f32.xlu2 %v346_v33 }
 0x312   :  { %v361_v34 = vsel %vm345_vm9, %v308_v31, -inf }
 0x313   :  { %362 = vmax.xlane.f32.xlu1 %v361_v34 }
 0x315   :  { %v237_v35 = vpop.f32.mrf.mxu1 }
 0x316   :  { %v238_v37 = vadd.f32 %v237_v35, %v80_v16  ;;  %v1804_v16 = vpack.i.bf16 %v2170_v60, %v2166_v59  ;;  %v1819_v59 = vpack.i.bf16 %v2150_v56, %v2156_v58 }
 0x318   :  { %v349_v38 = vsel %vm345_vm9, %v238_v37, -inf }
 0x319   :  { %350 = vmax.xlane.f32.xlu0 %v349_v38 }
 0x367   :  { %v354_v39 = vpop.xlane.xlu2 %353 }
 0x368   :  { %v372_v40 = vsub.f32 %v270_v14, %v354_v39 }
 0x36a   :  { %v382_v41 = vmul.f32 1.442695, %v372_v40 }
 0x36c   :  { %1852 = vpow2.f32 %v382_v41 }
 0x36f   :  { %v357_v44 = vpop.xlane.xlu0 %356 }
 0x370   :  { %v373_v3 = vsub.f32 %v273_v18, %v357_v44  ;;  %v1814_v18 = vpack.i.bf16 %v2186_v1, %v2174_v61 }
 0x372   :  { %v2229_v42 = vpop.eup %1852  ;;  %v384_v8 = vmul.f32 1.442695, %v373_v3 }
 0x373   :  { %v400_v43 = vsel %vm345_vm9, %v2229_v42, 0.0 }
 0x374   :  { %401 = vadd.xlane.f32.xlu1 %v400_v43 }
 0x37c   :  { %v366_v45 = vpop.xlane.xlu2 %365 }
 0x37d   :  { %v376_v46 = vsub.f32 %v340_v21, %v366_v45 }
 0x37e   :  { %v360_v47 = vpop.xlane.xlu1 %359 }
 0x37f   :  { %v390_v48 = vmul.f32 1.442695, %v376_v46  ;;  %v374_v49 = vsub.f32 %v305_v23, %v360_v47 }
 0x381   :  { %1854 = vpow2.f32 %v390_v48  ;;  %v386_v50 = vmul.f32 1.442695, %v374_v49 }
 0x383   :  { %1856 = vpow2.f32 %v386_v50 }
 0x384   :  { %v369_v51 = vpop.xlane.xlu0 %368  ;;  %v348_v19 = vpop.xlane.xlu2 %347 }
 0x385   :  { %v377_v52 = vsub.f32 %v343_v29, %v369_v51  ;;  %v370_v20 = vsub.f32 %v2222_v28, %v348_v19 }
 0x386   :  { %v363_v53 = vpop.xlane.xlu1 %362 }
 0x387   :  { %v2233_v54 = vpop.eup %1854  ;;  %v392_v55 = vmul.f32 1.442695, %v377_v52  ;;  %v375_v57 = vsub.f32 %v308_v31, %v363_v53  ;;  %v378_v21 = vmul.f32 1.442695, %v370_v20 }
 0x388   :  { %v412_v4 = vsel %vm345_vm9, %v2233_v54, 0.0 }
 0x389   :  { %v2237_v5 = vpop.eup %1856  ;;  %v388_v6 = vmul.f32 1.442695, %v375_v57  ;;  %413 = vadd.xlane.f32.xlu0 %v412_v4  ;;  %1858 = vpow2.f32 %v392_v55 }
 0x38a   :  { %v406_v7 = vsel %vm345_vm9, %v2237_v5, 0.0 }
 0x38b   :  { %1860 = vpow2.f32 %v388_v6  ;;  %407 = vadd.xlane.f32.xlu2 %v406_v7 }
 0x38c   :  { %1862 = vpow2.f32 %v384_v8  ;;  %v351_v60 = vpop.xlane.xlu0 %350 }
 0x38d   :  { %1864 = vpow2.f32 %v378_v21  ;;  %v371_v22 = vsub.f32 %v238_v37, %v351_v60 }
 0x38f   :  { %v2241_v9 = vpop.eup %1858  ;;  %v380_v63 = vmul.f32 1.442695, %v371_v22 }
 0x390   :  { %v415_v12 = vsel %vm345_vm9, %v2241_v9, 0.0 }
 0x391   :  { %v2243_v11 = vpop.eup %1860  ;;  %416 = vadd.xlane.f32.xlu1 %v415_v12  ;;  %1866 = vpow2.f32 %v380_v63 }
 0x392   :  { %v409_v13 = vsel %vm345_vm9, %v2243_v11, 0.0  ;;  %v2249_v14 = vpop.eup %1862 }
 0x393   :  { %410 = vadd.xlane.f32.xlu2 %v409_v13  ;;  %v403_v15 = vsel %vm345_vm9, %v2249_v14, 0.0  ;;  %v2266_v62 = vpop.eup %1864 }
 0x394   :  { %v394_v61 = vsel %vm345_vm9, %v2266_v62, 0.0 }
 0x397   :  { %v2270_v1 = vpop.eup %1866 }
 0x398   :  { %v397_v23 = vsel %vm345_vm9, %v2270_v1, 0.0 }
 0x399   :  { %404 = vadd.xlane.f32.xlu1 %v403_v15 }
 0x39d   :  { %1805 = vrot.lane.b32.xlu0 %v1804_v16, %s2046_s9 }
 0x3ab   :  { %1810 = vrot.lane.b32.xlu2 %v1809_v17, %s2046_s9 }
 0x3b2   :  { %1815 = vrot.lane.b32.xlu1 %v1814_v18, %s2046_s9 }
 0x3ba   :  { %1820 = vrot.lane.b32.xlu1 %v1819_v59, %s2046_s9 }
 0x3c7   :  { %395 = vadd.xlane.f32.xlu0 %v394_v61 }
 0x3d4   :  { %398 = vadd.xlane.f32.xlu2 %v397_v23 }
 0x3e7   :  { %v402_v56 = vpop.xlane.xlu1 %401 }
 0x3e8   :  { %1868 = vrcp.f32 %v402_v56  ;;  %v459_v35 = vand.u32 2147483648, %v402_v56  ;;  %vm453_vm11 = vweird.f32 %v402_v56  ;;  %v457_v37 = vand.u32 2147483647, %v402_v56 }
 0x3ea   :  { %v460_v46 = vor.u32 1.1754944e-38, %v459_v35  ;;  %vm458_vm15 = vcmp.eq.f32.partialorder %v457_v37, 8.507059e+37 }
 0x3ee   :  { %v1869_v58 = vpop.eup %1868 }
 0x3ef   :  { %v449_v24 = vmul.f32 %v1869_v58, %v402_v56  ;;  %vm454_vm10 = vweird.f32 %v1869_v58 }
 0x3f0   :  { %vm2279_vm12 = vmor %vm453_vm11, %vm454_vm10 }
 0x3f1   :  { %v450_v26 = vsub.f32 1.0, %v449_v24 }
 0x3f3   :  { %v451_v27 = vmul.f32 %v1869_v58, %v450_v26 }
 0x3f5   :  { %v452_v33 = vadd.f32 %v1869_v58, %v451_v27 }
 0x3f7   :  { %v456_v44 = vsel %vm2279_vm12, %v1869_v58, %v452_v33 }
 0x3f8   :  { %v461_v55 = vsel %vm458_vm15, %v460_v46, %v456_v44 }
 0x3f9   :  { %v462_v17 = vmul.f32 %v2229_v42, %v461_v55 }
 0x3fc   :  { %v2274_v29 = vpop.xlane.xlu0 %413 }
 0x3fd   :  { %v519_v37 = vand.u32 2147483648, %v2274_v29 }
 0x3fe   :  { %v408_v25 = vpop.xlane.xlu2 %407 }
 0x3ff   :  { %1870 = vrcp.f32 %v408_v25  ;;  %v489_v40 = vand.u32 2147483648, %v408_v25  ;;  %v487_v43 = vand.u32 2147483647, %v408_v25  ;;  %vm483_vm14 = vweird.f32 %v408_v25 }
 0x401   :  { %v490_v51 = vor.u32 1.1754944e-38, %v489_v40  ;;  %vm488_vm2 = vcmp.eq.f32.partialorder %v487_v43, 8.507059e+37  ;;  %v520_v40 = vor.u32 1.1754944e-38, %v519_v37 }
 0x404   :  { %v2276_v30 = vpop.xlane.xlu1 %416 }
 0x405   :  { %v1871_v28 = vpop.eup %1870 }
 0x406   :  { %v479_v31 = vmul.f32 %v1871_v28, %v408_v25  ;;  %v411_v32 = vpop.xlane.xlu2 %410  ;;  %vm484_vm13 = vweird.f32 %v1871_v28 }
 0x407   :  { %1872 = vrcp.f32 %v411_v32  ;;  %vm2287_vm1 = vmor %vm483_vm14, %vm484_vm13  ;;  %v504_v8 = vand.u32 2147483648, %v411_v32  ;;  %v502_v19 = vand.u32 2147483647, %v411_v32  ;;  %vm498_vm4 = vweird.f32 %v411_v32 }
 0x408   :  { %1874 = vrcp.f32 %v2274_v29  ;;  %v480_v34 = vsub.f32 1.0, %v479_v31  ;;  %vm513_vm14 = vweird.f32 %v2274_v29 }
 0x409   :  { %v505_v22 = vor.u32 1.1754944e-38, %v504_v8  ;;  %vm503_vm6 = vcmp.eq.f32.partialorder %v502_v19, 8.507059e+37 }
 0x40a   :  { %v481_v38 = vmul.f32 %v1871_v28, %v480_v34 }
 0x40c   :  { %v482_v41 = vadd.f32 %v1871_v28, %v481_v38  ;;  %v405_v47 = vpop.xlane.xlu1 %404 }
 0x40d   :  { %v1873_v45 = vpop.eup %1872  ;;  %1876 = vrcp.f32 %v405_v47  ;;  %v474_v42 = vand.u32 2147483648, %v405_v47  ;;  %v472_v58 = vand.u32 2147483647, %v405_v47  ;;  %vm468_vm10 = vweird.f32 %v405_v47 }
 0x40e   :  { %v2285_v48 = vpop.eup %1874  ;;  %v494_v50 = vmul.f32 %v1873_v45, %v411_v32  ;;  %v1811_v52 = vpop.permute.xlu2 %1810  ;;  %v486_v57 = vsel %vm2287_vm1, %v1871_v28, %v482_v41  ;;  %1878 = vrcp.f32 %v2276_v30  ;;  %vm499_vm3 = vweird.f32 %v1873_v45 }
 0x40f   :  { %v1806_v53 = vpop.permute.xlu0 %1805  ;;  %v509_v7 = vmul.f32 %v2285_v48, %v2274_v29  ;;  %v491_v12 = vsel %vm488_vm2, %v490_v51, %v486_v57  ;;  %v1812_v15 = vunpack.i.l.bf16 %v1811_v52  ;;  %v1813_v16 = vunpack.i.h.bf16 %v1811_v52  ;;  %vm500_vm5 = vmor %vm498_vm4, %vm499_vm3 }
 0x410   :  { %v495_v3 = vsub.f32 1.0, %v494_v50  ;;  %v1807_v4 = vunpack.i.l.bf16 %v1806_v53  ;;  %v1808_v6 = vunpack.i.h.bf16 %v1806_v53  ;;  %v492_v18 = vmul.f32 %v2237_v5, %v491_v12 }
 0x411   :  { %v510_v60 = vsub.f32 1.0, %v509_v7  ;;  %v475_v28 = vor.u32 1.1754944e-38, %v474_v42  ;;  %vm473_vm12 = vcmp.eq.f32.partialorder %v472_v58, 8.507059e+37  ;;  %vm514_vm13 = vweird.f32 %v2285_v48 }
 0x412   :  { %v496_v13 = vmul.f32 %v1873_v45, %v495_v3  ;;  %599 = vmatpush.msrb.mxu2 %v1807_v4  ;;  %634 = vmatpush.msrb.mxu3 %v1808_v6  ;;  %vm515_vm15 = vmor %vm513_vm14, %vm514_vm13  ;;  %vm528_vm3 = vweird.f32 %v2276_v30 }
 0x413   :  { %v1877_v20 = vpop.eup %1876  ;;  %v511_v24 = vmul.f32 %v2285_v48, %v510_v60 }
 0x414   :  { %600 = vmatpush.msrb.mxu2 %v1812_v15  ;;  %635 = vmatpush.msrb.mxu3 %v1813_v16  ;;  %v497_v21 = vadd.f32 %v1873_v45, %v496_v13  ;;  %v464_v59 = vmul.f32 %v1877_v20, %v405_v47  ;;  %v1879_v61 = vpop.eup %1878  ;;  %vm469_vm7 = vweird.f32 %v1877_v20  ;;  %v532_v47 = vand.u32 2147483647, %v2276_v30 }
 0x415   :  { %1726 = vmatmul.msk.f32.vlgmr.msrb.gmra.mxu2 %vm345_vm9, %v462_v17  ;;  %1728 = vmatmul.msk.f32.vlgmr.msrb.gmra.mxu3 %vm345_vm9, %v492_v18  ;;  %v524_v25 = vmul.f32 %v1879_v61, %v2276_v30  ;;  %vm470_vm11 = vmor %vm468_vm10, %vm469_vm7  ;;  %v512_v33 = vadd.f32 %v2285_v48, %v511_v24  ;;  %vm529_vm2 = vweird.f32 %v1879_v61  ;;  %v89_v24 = vld [vmem:[%s2796_s3 + $0x18] sm:$0xff] }
 0x416   :  { %v501_v63 = vsel %vm500_vm5, %v1873_v45, %v497_v21  ;;  %v465_v23 = vsub.f32 1.0, %v464_v59  ;;  %vm530_vm4 = vmor %vm528_vm3, %vm529_vm2  ;;  %vm533_vm5 = vcmp.eq.f32.partialorder %v532_v47, 8.507059e+37 }
 0x417   :  { %v506_v5 = vsel %vm503_vm6, %v505_v22, %v501_v63  ;;  %v525_v34 = vsub.f32 1.0, %v524_v25  ;;  %v516_v38 = vsel %vm515_vm15, %v2285_v48, %v512_v33  ;;  %v88_v25 = vld [vmem:[%s2796_s3 + $0x10] sm:$0xff] }
 0x418   :  { %v466_v56 = vmul.f32 %v1877_v20, %v465_v23  ;;  %v507_v26 = vmul.f32 %v2243_v11, %v506_v5  ;;  %v517_v11 = vand.u32 2147483647, %v2274_v29 }
 0x419   :  { %v526_v39 = vmul.f32 %v1879_v61, %v525_v34 }
 0x41a   :  { %v467_v27 = vadd.f32 %v1877_v20, %v466_v56  ;;  %vm518_vm1 = vcmp.eq.f32.partialorder %v517_v11, 8.507059e+37 }
 0x41b   :  { %v521_v43 = vsel %vm518_vm1, %v520_v40, %v516_v38  ;;  %v527_v45 = vadd.f32 %v1879_v61, %v526_v39  ;;  %vm706_vm1 = vcmask 195584  }
 0x41c   :  { %v471_v31 = vsel %vm470_vm11, %v1877_v20, %v467_v27  ;;  %v522_v29 = vmul.f32 %v2233_v54, %v521_v43  ;;  %v86_v27 = vld [vmem:[%s2796_s3] sm:$0xff] }
 0x41d   :  { %1729 = vmatmul.msk.f32.gmra.mxu3 %vm345_vm9, %v507_v26  ;;  %v476_v32 = vsel %vm473_vm12, %v475_v28, %v471_v31  ;;  %v531_v48 = vsel %vm530_vm4, %v1879_v61, %v527_v45  ;;  %v87_v26 = vld [vmem:[%s2796_s3 + $0x8] sm:$0xff]  ;;  %v740_v45 = vperm.slane %v2143_v36, 4 }
 0x41e   :  { %v477_v35 = vmul.f32 %v2249_v14, %v476_v32  ;;  %v534_v14 = vand.u32 2147483648, %v2276_v30 }
 0x420   :  { %1727 = vmatmul.msk.f32.gmra.mxu2 %vm345_vm9, %v477_v35  ;;  %v535_v49 = vor.u32 1.1754944e-38, %v534_v14 }
 0x422   :  { %v536_v52 = vsel %vm533_vm5, %v535_v49, %v531_v48 }
 0x423   :  { %v537_v55 = vmul.f32 %v2241_v9, %v536_v52 }
 0x424   :  { %v1816_v41 = vpop.permute.xlu1 %1815 }
 0x425   :  { %v1817_v44 = vunpack.i.l.bf16 %v1816_v41  ;;  %v1818_v46 = vunpack.i.h.bf16 %v1816_v41 }
 0x427   :  { %669 = vmatpush.msra.mxu0 %v1817_v44 }
 0x429   :  { %670 = vmatpush.msra.mxu0 %v1818_v46 }
 0x42a   :  { %1730 = vmatmul.msk.f32.vlgmr.msra.gmra.mxu0 %vm345_vm9, %v522_v29 }
 0x42c   :  { %v1821_v50 = vpop.permute.xlu1 %1820 }
 0x42d   :  { %v1822_v51 = vunpack.i.l.bf16 %v1821_v50  ;;  %v1823_v53 = vunpack.i.h.bf16 %v1821_v50 }
 0x42f   :  { %564 = vmatpush.msrb.mxu1 %v1822_v51 }
 0x431   :  { %565 = vmatpush.msrb.mxu1 %v1823_v53 }
 0x432   :  { %1731 = vmatmul.msk.f32.gmra.mxu0 %vm345_vm9, %v537_v55 }
 0x433   :  { %727 = vmatpush.msra.mxu1 %v89_v24 }
 0x435   :  { %728 = vmatpush.msra.mxu1 %v88_v25 }
 0x437   :  { %729 = vmatpush.msra.mxu1 %v87_v26  ;;  %v790_v26 = vperm.slane %v2143_v36, 3 }
 0x439   :  { %730 = vmatpush.msra.mxu1 %v86_v27 }
 0x43a   :  { %v396_v54 = vpop.xlane.xlu0 %395 }
 0x43b   :  { %1880 = vrcp.f32 %v396_v54  ;;  %v429_v4 = vand.u32 2147483648, %v396_v54  ;;  %v427_v7 = vand.u32 2147483647, %v396_v54  ;;  %vm423_vm7 = vweird.f32 %v396_v54 }
 0x43d   :  { %v430_v13 = vor.u32 1.1754944e-38, %v429_v4  ;;  %vm428_vm11 = vcmp.eq.f32.partialorder %v427_v7, 8.507059e+37  ;;  %v92_v7 = vld [vmem:[%s2797_s4 + $0x10] sm:$0xff] }
 0x441   :  { %v1881_v30 = vpop.eup %1880 }
 0x442   :  { %v419_v57 = vmul.f32 %v1881_v30, %v396_v54  ;;  %vm424_vm6 = vweird.f32 %v1881_v30 }
 0x443   :  { %vm425_vm10 = vmor %vm423_vm7, %vm424_vm6 }
 0x444   :  { %v420_v3 = vsub.f32 1.0, %v419_v57 }
 0x446   :  { %v421_v6 = vmul.f32 %v1881_v30, %v420_v3 }
 0x447   :  { %v399_v8 = vpop.xlane.xlu2 %398 }
 0x448   :  { %v422_v12 = vadd.f32 %v1881_v30, %v421_v6  ;;  %1882 = vrcp.f32 %v399_v8  ;;  %v444_v20 = vand.u32 2147483648, %v399_v8  ;;  %v442_v59 = vand.u32 2147483647, %v399_v8  ;;  %v93_v6 = vld [vmem:[%s2797_s4 + $0x18] sm:$0xff] }
 0x449   :  { %vm438_vm13 = vweird.f32 %v399_v8  ;;  %812 = vmatpush.msra.mxu2 %v93_v6 }
 0x44a   :  { %v426_v9 = vsel %vm425_vm10, %v1881_v30, %v422_v12  ;;  %v445_v22 = vor.u32 1.1754944e-38, %v444_v20  ;;  %vm443_vm15 = vcmp.eq.f32.partialorder %v442_v59, 8.507059e+37  ;;  %v90_v12 = vld [vmem:[%s2797_s4] sm:$0xff]  ;;  %vm825_vm10 = vcmask 523264  }
 0x44b   :  { %v431_v15 = vsel %vm428_vm11, %v430_v13, %v426_v9  ;;  %813 = vmatpush.msra.mxu2 %v92_v7 }
 0x44c   :  { %v432_v16 = vmul.f32 %v2266_v62, %v431_v15 }
 0x44e   :  { %v1883_v17 = vpop.eup %1882  ;;  %1724 = vmatmul.msk.f32.vlgmr.msrb.gmra.mxu1 %vm345_vm9, %v432_v16  ;;  %v101_v16 = vld [vmem:[%s2798_s5 + $0x38] sm:$0xff] }
 0x44f   :  { %v434_v18 = vmul.f32 %v1883_v17, %v399_v8  ;;  %vm439_vm12 = vweird.f32 %v1883_v17  ;;  %v91_v8 = vld [vmem:[%s2797_s4 + $0x8] sm:$0xff]  ;;  %840 = vmatpush.msra.mxu3 %v101_v16 }
 0x450   :  { %vm440_vm14 = vmor %vm438_vm13, %vm439_vm12  ;;  %814 = vmatpush.msra.mxu2 %v91_v8 }
 0x451   :  { %v435_v19 = vsub.f32 1.0, %v434_v18  ;;  %v99_v18 = vld [vmem:[%s2798_s5 + $0x28] sm:$0xff] }
 0x452   :  { %815 = vmatpush.msra.mxu2 %v90_v12  ;;  %v1741_v12 = vld [vmem:[%s2795_s2 + $0x38] sm:$0xff] }
 0x453   :  { %v436_v21 = vmul.f32 %v1883_v17, %v435_v19  ;;  %955 = vmatpush.msrb.mxu0 %v1741_v12 }
 0x455   :  { %v437_v60 = vadd.f32 %v1883_v17, %v436_v21  ;;  %v98_v21 = vld [vmem:[%s2798_s5 + $0x20] sm:$0xff] }
 0x457   :  { %v441_v63 = vsel %vm440_vm14, %v1883_v17, %v437_v60  ;;  %v100_v17 = vld [vmem:[%s2798_s5 + $0x30] sm:$0xff] }
 0x458   :  { %v446_v61 = vsel %vm443_vm15, %v445_v22, %v441_v63  ;;  %841 = vmatpush.msra.mxu3 %v100_v17  ;;  %v97_v22 = vld [vmem:[%s2798_s5 + $0x18] sm:$0xff] }
 0x459   :  { %v447_v23 = vmul.f32 %v2270_v1, %v446_v61 }
 0x45a   :  { %842 = vmatpush.msra.mxu3 %v99_v18 }
 0x45b   :  { %1725 = vmatmul.msk.f32.gmra.mxu1 %vm345_vm9, %v447_v23 }
 0x45c   :  { %843 = vmatpush.msra.mxu3 %v98_v21 }
 0x45e   :  { %844 = vmatpush.msra.mxu3 %v97_v22 }
 0x498   :  { %v602_v62 = vpop.f32.mrf.mxu2  ;;  %v637_v58 = vpop.f32.mrf.mxu3 }
 0x4a0   :  { %v640_v1 = vpop.f32.mrf.mxu3 }
 0x4a3   :  { %v605_v42 = vpop.f32.mrf.mxu2 }
 0x4a4   :  { %682 = vrot.lane.b32.xlu0 %v605_v42, %s2038_s14 }
 0x4a7   :  { %v672_v5 = vpop.f32.mrf.mxu0 }
 0x4a8   :  { %696 = vrot.lane.b32.xlu1 %v672_v5, %s2047_s10 }
 0x4af   :  { %v675_v56 = vpop.f32.mrf.mxu0 }
 0x4b0   :  { %698 = vrot.lane.b32.xlu2 %v675_v56, %s2047_s10  ;;  %680 = vrot.lane.b32.xlu1 %v602_v62, %s2038_s14 }
 0x4b8   :  { %688 = vrot.lane.b32.xlu1 %v637_v58, %s2048_s11  ;;  %v787_v58 = vperm.slane %v2143_v36, 2 }
 0x4c0   :  { %690 = vrot.lane.b32.xlu1 %v640_v1, %s2048_s11 }
 0x4cb   :  { %v567_v32 = vpop.f32.mrf.mxu1 }
 0x4d8   :  { %v570_v38 = vpop.f32.mrf.mxu1 }
 0x50a   :  { %v699_v41 = vpop.permute.xlu2 %698 }
 0x516   :  { %v683_v11 = vpop.permute.xlu0 %682 }
 0x517   :  { %v703_v39 = vsel %vm208_vm8, %v570_v38, %v683_v11  ;;  %v96_v38 = vld [vmem:[%s2798_s5 + $0x10] sm:$0xff] }
 0x518   :  { %845 = vmatpush.msra.mxu3 %v96_v38 }
 0x51a   :  { %v697_v28 = vpop.permute.xlu1 %696 }
 0x522   :  { %v681_v31 = vpop.permute.xlu1 %680 }
 0x523   :  { %v702_v33 = vsel %vm208_vm8, %v567_v32, %v681_v31 }
 0x52a   :  { %v689_v34 = vpop.permute.xlu1 %688 }
 0x52b   :  { %v704_v35 = vsel %vm345_vm9, %v702_v33, %v689_v34 }
 0x52c   :  { %v707_v37 = vsel %vm706_vm1, %v704_v35, %v697_v28 }
 0x52d   :  { %1732 = vmatmul.msk.f32.vlgmr.msra.gmra.mxu1 %vm102_vm0, %v707_v37 }
 0x532   :  { %v691_v40 = vpop.permute.xlu1 %690 }
 0x533   :  { %v705_v43 = vsel %vm345_vm9, %v703_v39, %v691_v40  ;;  %v95_v39 = vld [vmem:[%s2798_s5 + $0x8] sm:$0xff]  ;;  %v94_v40 = vld [vmem:[%s2798_s5] sm:$0xff] }
 0x534   :  { %v708_v44 = vsel %vm706_vm1, %v705_v43, %v699_v41  ;;  %846 = vmatpush.msra.mxu3 %v95_v39  ;;  %v793_v41 = vperm.slane %v2143_v36, 7 }
 0x535   :  { %1733 = vmatmul.msk.f32.gmra.mxu1 %vm102_vm0, %v708_v44 }
 0x536   :  { %847 = vmatpush.msra.mxu3 %v94_v40 }
 0x5aa   :  { %v732_v14 = vpop.f32.mrf.mxu1 }
 0x5ab   :  { %v738_v46 = vadd.f32 %v732_v14, %v2113_v0 }
 0x5ad   :  { %v2351_v29 = vadd.f32 %v740_v45, %v738_v46 }
 0x5af   :  { %v743_v47 = vsel %vm102_vm0, %v2351_v29, 0.0 }
 0x5b0   :  { %744 = vadd.xlane.f32.xlu1 %v743_v47 }
 0x5b2   :  { %v735_v48 = vpop.f32.mrf.mxu1 }
 0x5b3   :  { %v739_v49 = vadd.f32 %v735_v48, %v2117_v2  ;;  %v857_v48 = vperm.slane %v2143_v36, 5 }
 0x5b5   :  { %v2356_v50 = vadd.f32 %v740_v45, %v739_v49 }
 0x5b7   :  { %v746_v51 = vsel %vm102_vm0, %v2356_v50, 0.0 }
 0x5b8   :  { %747 = vadd.xlane.f32.xlu0 %v746_v51 }
 0x623   :  { %v745_v52 = vpop.xlane.xlu1 %744 }
 0x624   :  { %v749_v53 = vmul.f32 %v745_v52, %v2121_v10 }
 0x626   :  { %v751_v0 = vsub.f32 %v2351_v29, %v749_v53 }
 0x628   :  { %v753_v55 = vmul.f32 %v751_v0, %v751_v0 }
 0x62a   :  { %v755_v54 = vsel %vm102_vm0, %v753_v55, 0.0 }
 0x62b   :  { %756 = vadd.xlane.f32.xlu2 %v755_v54  ;;  %v748_v30 = vpop.xlane.xlu0 %747 }
 0x62c   :  { %v750_v57 = vmul.f32 %v748_v30, %v2121_v10 }
 0x62e   :  { %v752_v2 = vsub.f32 %v2356_v50, %v750_v57 }
 0x630   :  { %v754_v3 = vmul.f32 %v752_v2, %v752_v2 }
 0x632   :  { %v758_v4 = vsel %vm102_vm0, %v754_v3, 0.0 }
 0x633   :  { %759 = vadd.xlane.f32.xlu1 %v758_v4 }
 0x69e   :  { %v757_v13 = vpop.xlane.xlu2 %756 }
 0x69f   :  { %v761_v9 = vmul.f32 %v757_v13, %v2121_v10  ;;  %v1740_v13 = vld [vmem:[%s2795_s2 + $0x30] sm:$0xff] }
 0x6a0   :  { %956 = vmatpush.msrb.mxu0 %v1740_v13 }
 0x6a1   :  { %v763_v15 = vadd.f32 1e-05, %v761_v9  ;;  %v1739_v9 = vld [vmem:[%s2795_s2 + $0x28] sm:$0xff] }
 0x6a2   :  { %957 = vmatpush.msrb.mxu0 %v1739_v9 }
 0x6a3   :  { %1884 = vrsqrt.f32 %v763_v15  ;;  %vm771_vm3 = vweird.f32 %v763_v15 }
 0x6a6   :  { %v760_v19 = vpop.xlane.xlu1 %759 }
 0x6a7   :  { %v762_v20 = vmul.f32 %v760_v19, %v2121_v10 }
 0x6a9   :  { %v1885_v59 = vpop.eup %1884  ;;  %v764_v60 = vadd.f32 1e-05, %v762_v20 }
 0x6aa   :  { %v766_v63 = vmul.f32 %v1885_v59, %v763_v15  ;;  %vm772_vm2 = vweird.f32 %v1885_v59  ;;  %v1738_v15 = vld [vmem:[%s2795_s2 + $0x20] sm:$0xff] }
 0x6ab   :  { %1886 = vrsqrt.f32 %v764_v60  ;;  %vm773_vm4 = vmor %vm771_vm3, %vm772_vm2  ;;  %vm781_vm6 = vweird.f32 %v764_v60  ;;  %958 = vmatpush.msrb.mxu0 %v1738_v15 }
 0x6ac   :  { %v767_v61 = vmul.f32 %v1885_v59, %v766_v63 }
 0x6ae   :  { %v768_v23 = vmul.f32 0.5, %v767_v61  ;;  %v2442_v61 = vld [vmem:[#allocation7 + $0x8] sm:$0xff] }
 0x6b0   :  { %v769_v62 = vsub.f32 1.5, %v768_v23 }
 0x6b1   :  { %v1887_v42 = vpop.eup %1886 }
 0x6b2   :  { %v770_v5 = vmul.f32 %v1885_v59, %v769_v62  ;;  %v776_v56 = vmul.f32 %v1887_v42, %v764_v60  ;;  %vm782_vm5 = vweird.f32 %v1887_v42 }
 0x6b3   :  { %vm783_vm7 = vmor %vm781_vm6, %vm782_vm5 }
 0x6b4   :  { %v774_v1 = vsel %vm773_vm4, %v1885_v59, %v770_v5  ;;  %v777_v24 = vmul.f32 %v1887_v42, %v776_v56  ;;  %v930_v56 = vperm.slane %v2442_v61, 0 }
 0x6b5   :  { %v785_v25 = vmul.f32 %v774_v1, %v751_v0 }
 0x6b6   :  { %v778_v27 = vmul.f32 0.5, %v777_v24 }
 0x6b7   :  { %v788_v28 = vmul.f32 %v787_v58, %v785_v25  ;;  %v933_v25 = vperm.slane %v2442_v61, 1 }
 0x6b8   :  { %v779_v31 = vsub.f32 1.5, %v778_v27 }
 0x6b9   :  { %v791_v32 = vadd.f32 %v790_v26, %v788_v28 }
 0x6ba   :  { %v780_v33 = vmul.f32 %v1887_v42, %v779_v31 }
 0x6bb   :  { %1734 = vmatmul.msk.f32.vlgmr.msra.gmra.mxu2 %vm102_vm0, %v791_v32 }
 0x6bc   :  { %v784_v34 = vsel %vm783_vm7, %v1887_v42, %v780_v33 }
 0x6bd   :  { %v786_v35 = vmul.f32 %v784_v34, %v752_v2 }
 0x6bf   :  { %v789_v37 = vmul.f32 %v787_v58, %v786_v35 }
 0x6c1   :  { %v792_v11 = vadd.f32 %v790_v26, %v789_v37 }
 0x6c3   :  { %1735 = vmatmul.msk.f32.gmra.mxu2 %vm102_vm0, %v792_v11  ;;  %v936_v11 = vperm.slane %v2442_v61, 6 }
 0x73e   :  { %v817_v43 = vpop.f32.mrf.mxu2 }
 0x73f   :  { %v818_v44 = vadd.f32 %v817_v43, %v793_v41 }
 0x741   :  { %v823_v45 = vmax.f32 %v818_v44, 0.0 }
 0x743   :  { %1736 = vmatmul.msk.f32.vlgmr.msra.gmra.mxu3 %vm825_vm10, %v823_v45 }
 0x746   :  { %v820_v14 = vpop.f32.mrf.mxu2 }
 0x747   :  { %v821_v46 = vadd.f32 %v820_v14, %v793_v41 }
 0x749   :  { %v824_v47 = vmax.f32 %v821_v46, 0.0 }
 0x74b   :  { %1737 = vmatmul.msk.f32.gmra.mxu3 %vm825_vm10, %v824_v47 }
 0x7c6   :  { %v849_v49 = vpop.f32.mrf.mxu3 }
 0x7c7   :  { %v855_v51 = vadd.f32 %v849_v49, %v2351_v29 }
 0x7c9   :  { %v2413_v52 = vadd.f32 %v857_v48, %v855_v51 }
 0x7cb   :  { %v886_v53 = vsel %vm102_vm0, %v2413_v52, 0.0 }
 0x7cc   :  { %887 = vadd.xlane.f32.xlu1 %v886_v53 }
 0x7ce   :  { %v852_v0 = vpop.f32.mrf.mxu3 }
 0x7cf   :  { %v856_v55 = vadd.f32 %v852_v0, %v2356_v50 }
 0x7d1   :  { %v2418_v54 = vadd.f32 %v857_v48, %v856_v55 }
 0x7d3   :  { %v889_v30 = vsel %vm102_vm0, %v2418_v54, 0.0 }
 0x7d4   :  { %890 = vadd.xlane.f32.xlu0 %v889_v30 }
 0x83f   :  { %v888_v57 = vpop.xlane.xlu1 %887 }
 0x840   :  { %v892_v36 = vmul.f32 %v888_v57, %v2121_v10 }
 0x842   :  { %v894_v29 = vsub.f32 %v2413_v52, %v892_v36 }
 0x844   :  { %v896_v2 = vmul.f32 %v894_v29, %v894_v29 }
 0x846   :  { %v898_v3 = vsel %vm102_vm0, %v896_v2, 0.0 }
 0x847   :  { %899 = vadd.xlane.f32.xlu1 %v898_v3  ;;  %v891_v4 = vpop.xlane.xlu0 %890 }
 0x848   :  { %v893_v6 = vmul.f32 %v891_v4, %v2121_v10 }
 0x84a   :  { %v895_v50 = vsub.f32 %v2418_v54, %v893_v6  ;;  %v1933_v6 = vld [vmem:[#allocation5 + $0x8] sm:$0xff] }
 0x84c   :  { %v897_v7 = vmul.f32 %v895_v50, %v895_v50 }
 0x84e   :  { %v901_v8 = vsel %vm102_vm0, %v897_v7, 0.0 }
 0x84f   :  { %902 = vadd.xlane.f32.xlu0 %v901_v8 }
 0x8ba   :  { %v900_v16 = vpop.xlane.xlu1 %899 }
 0x8bb   :  { %v904_v17 = vmul.f32 %v900_v16, %v2121_v10 }
 0x8bd   :  { %v906_v18 = vadd.f32 1e-05, %v904_v17 }
 0x8bf   :  { %1888 = vrsqrt.f32 %v906_v18  ;;  %vm914_vm12 = vweird.f32 %v906_v18 }
 0x8c2   :  { %v903_v19 = vpop.xlane.xlu0 %902 }
 0x8c3   :  { %v905_v20 = vmul.f32 %v903_v19, %v2121_v10 }
 0x8c5   :  { %v1889_v21 = vpop.eup %1888  ;;  %v907_v59 = vadd.f32 1e-05, %v905_v20 }
 0x8c6   :  { %v909_v60 = vmul.f32 %v1889_v21, %v906_v18  ;;  %vm915_vm11 = vweird.f32 %v1889_v21 }
 0x8c7   :  { %1890 = vrsqrt.f32 %v907_v59  ;;  %vm916_vm13 = vmor %vm914_vm12, %vm915_vm11  ;;  %vm924_vm15 = vweird.f32 %v907_v59 }
 0x8c8   :  { %v910_v22 = vmul.f32 %v1889_v21, %v909_v60 }
 0x8ca   :  { %v911_v63 = vmul.f32 0.5, %v910_v22 }
 0x8cc   :  { %v912_v23 = vsub.f32 1.5, %v911_v63 }
 0x8cd   :  { %v1891_v62 = vpop.eup %1890 }
 0x8ce   :  { %v913_v42 = vmul.f32 %v1889_v21, %v912_v23  ;;  %v919_v5 = vmul.f32 %v1891_v62, %v907_v59  ;;  %vm925_vm14 = vweird.f32 %v1891_v62 }
 0x8cf   :  { %vm926_vm2 = vmor %vm924_vm15, %vm925_vm14 }
 0x8d0   :  { %v917_v58 = vsel %vm916_vm13, %v1889_v21, %v913_v42  ;;  %v920_v1 = vmul.f32 %v1891_v62, %v919_v5 }
 0x8d1   :  { %v928_v24 = vmul.f32 %v917_v58, %v894_v29  ;;  %v1932_v29 = vld [vmem:[#allocation5] sm:$0xff] }
 0x8d2   :  { %v921_v26 = vmul.f32 0.5, %v920_v1 }
 0x8d3   :  { %v931_v27 = vmul.f32 %v930_v56, %v928_v24 }
 0x8d4   :  { %v922_v28 = vsub.f32 1.5, %v921_v26 }
 0x8d5   :  { %v934_v31 = vadd.f32 %v933_v25, %v931_v27 }
 0x8d6   :  { %v923_v32 = vmul.f32 %v1891_v62, %v922_v28 }
 0x8d7   :  { %1758 = vmatmul.msk.f32.vlgmr.msrb.gmra.mxu0 %vm102_vm0, %v934_v31 }
 0x8d8   :  { %v927_v33 = vsel %vm926_vm2, %v1891_v62, %v923_v32 }
 0x8d9   :  { %v929_v34 = vmul.f32 %v927_v33, %v895_v50 }
 0x8db   :  { %v932_v35 = vmul.f32 %v930_v56, %v929_v34 }
 0x8dd   :  { %v935_v37 = vadd.f32 %v933_v25, %v932_v35 }
 0x8df   :  { %1759 = vmatmul.msk.f32.gmra.mxu0 %vm102_vm0, %v935_v37 }
 0x954   :  { %v960_v38 = vpop.f32.mrf.mxu0 }
 0x955   :  { %v2449_v39 = vadd.f32 %v960_v38, %v936_v11 }
 0x957   :  { %968 = vrot.lane.b32.xlu0 %v2449_v39, %s2042_s27 }
 0x95c   :  { %v963_v40 = vpop.f32.mrf.mxu0 }
 0x95d   :  { %v2453_v41 = vadd.f32 %v963_v40, %v936_v11 }
 0x95f   :  { %978 = vrot.lane.b32.xlu0 %v2453_v41, %s2044_s29  ;;  %974 = vrot.lane.b32.xlu1 %v2453_v41, %s2043_s28 }
 0x960   :  { %970 = vrot.lane.b32.xlu2 %v2453_v41, %s2042_s27 }
 0x967   :  { %976 = vrot.lane.b32.xlu1 %v2449_v39, %s2044_s29 }
 0x968   :  { %972 = vrot.lane.b32.xlu2 %v2449_v39, %s2043_s28 }
 0x9ba   :  { %v2465_v43 = vpop.permute.xlu2 %970 }
 0x9bb   :  { %1017 = vrot.lane.b32.xlu2 %v2465_v43, %s2045_s30 }
 0x9c2   :  { %v2469_v44 = vpop.permute.xlu2 %972 }
 0x9c3   :  { %1050 = vrot.lane.b32.xlu2 %v2469_v44, %s2045_s30 }
 0x9c9   :  { %v2473_v45 = vpop.permute.xlu0 %968 }
 0x9ca   :  { %1015 = vrot.lane.b32.xlu1 %v2473_v45, %s2045_s30 }
 0x9cb   :  { %982 = vrot.lane.b32.xlu2 %v2453_v41, %s2045_s30 }
 0x9d1   :  { %v2479_v14 = vpop.permute.xlu1 %974  ;;  %v2483_v46 = vpop.permute.xlu0 %978 }
 0x9d2   :  { %1052 = vrot.lane.b32.xlu0 %v2479_v14, %s2045_s30 }
 0x9d9   :  { %v2485_v47 = vpop.permute.xlu1 %976 }
 0x9da   :  { %1085 = vrot.lane.b32.xlu1 %v2485_v47, %s2045_s30  ;;  %1087 = vrot.lane.b32.xlu0 %v2483_v46, %s2045_s30 }
 0x9e2   :  { %980 = vrot.lane.b32.xlu0 %v2449_v39, %s2045_s30 }
 0xa15   :  { %v1018_v48 = vpop.permute.xlu2 %1017 }
 0xa16   :  { %1764 = vmatpush.xpose.msk.msrb.mxu2 %vm208_vm8, %v1018_v48 }
 0xa1d   :  { %v1051_v49 = vpop.permute.xlu2 %1050 }
 0xa25   :  { %v983_v51 = vpop.permute.xlu2 %982 }
 0xa26   :  { %1760 = vmatpush.xpose.msk.msrb.mxu1 %vm208_vm8, %v983_v51 }
 0xa3c   :  { %v1016_v53 = vpop.permute.xlu1 %1015 }
 0xa3d   :  { %1765 = vmatpush.xpose.msk.msrb.mxu2 %vm208_vm8, %v1016_v53 }
 0xa40   :  { %1766 = vmatmul.msk.f32.vlgmr.msrb.gmra.mxu2 %vm208_vm8, %v2473_v45 }
 0xa44   :  { %v1053_v0 = vpop.permute.xlu0 %1052 }
 0xa45   :  { %1768 = vmatpush.xpose.msk.msrb.mxu3 %vm208_vm8, %v1053_v0 }
 0xa48   :  { %1767 = vmatmul.msk.f32.gmra.mxu2 %vm208_vm8, %v2465_v43 }
 0xa49   :  { %1769 = vmatpush.xpose.msk.msrb.mxu3 %vm208_vm8, %v1051_v49 }
 0xa4c   :  { %1770 = vmatmul.msk.f32.vlgmr.msrb.gmra.mxu3 %vm208_vm8, %v2469_v44  ;;  %v1088_v55 = vpop.permute.xlu0 %1087  ;;  %v1086_v30 = vpop.permute.xlu1 %1085 }
 0xa4d   :  { %1772 = vmatpush.xpose.msk.msra.mxu0 %vm208_vm8, %v1088_v55 }
 0xa51   :  { %1773 = vmatpush.xpose.msk.msra.mxu0 %vm208_vm8, %v1086_v30 }
 0xa54   :  { %1771 = vmatmul.msk.f32.gmra.mxu3 %vm208_vm8, %v2479_v14  ;;  %1774 = vmatmul.msk.f32.vlgmr.msra.gmra.mxu0 %vm208_vm8, %v2485_v47  ;;  %v981_v57 = vpop.permute.xlu0 %980 }
 0xa55   :  { %1761 = vmatpush.xpose.msk.msrb.mxu1 %vm208_vm8, %v981_v57 }
 0xa58   :  { %1762 = vmatmul.msk.f32.vlgmr.msrb.gmra.mxu1 %vm208_vm8, %v2449_v39 }
 0xa5c   :  { %1775 = vmatmul.msk.f32.gmra.mxu0 %vm208_vm8, %v2483_v46 }
 0xa60   :  { %1763 = vmatmul.msk.f32.gmra.mxu1 %vm208_vm8, %v2453_v41 }
 0xac3   :  { %v1044_v36 = vpop.f32.mrf.mxu2 }
 0xac4   :  { %v1045_v2 = vadd.f32 %v1932_v29, %v1044_v36 }
 0xac6   :  { %v1126_v3 = vsel %vm345_vm9, %v1045_v2, -inf }
 0xac7   :  { %1127 = vmax.xlane.f32.xlu1 %v1126_v3 }
 0xacb   :  { %v1047_v4 = vpop.f32.mrf.mxu2 }
 0xacc   :  { %v1048_v50 = vadd.f32 %v1933_v6, %v1047_v4  ;;  %v1824_v4 = vpack.i.bf16 %v2479_v14, %v2465_v43 }
 0xace   :  { %v1129_v7 = vsel %vm345_vm9, %v1048_v50, -inf }
 0xacf   :  { %1130 = vmax.xlane.f32.xlu0 %v1129_v7  ;;  %v1079_v8 = vpop.f32.mrf.mxu3 }
 0xad0   :  { %v1080_v12 = vadd.f32 %v1932_v29, %v1079_v8 }
 0xad1   :  { %v1114_v13 = vpop.f32.mrf.mxu0 }
 0xad2   :  { %v1115_v9 = vadd.f32 %v1932_v29, %v1114_v13  ;;  %v1132_v15 = vsel %vm345_vm9, %v1080_v12, -inf }
 0xad3   :  { %1133 = vmax.xlane.f32.xlu2 %v1132_v15 }
 0xad4   :  { %v1138_v16 = vsel %vm345_vm9, %v1115_v9, -inf }
 0xad5   :  { %1139 = vmax.xlane.f32.xlu1 %v1138_v16  ;;  %v1009_v17 = vpop.f32.mrf.mxu1 }
 0xad6   :  { %v2521_v19 = vadd.f32 %v1932_v29, %v1009_v17 }
 0xad7   :  { %v1082_v18 = vpop.f32.mrf.mxu3 }
 0xad8   :  { %v1083_v20 = vadd.f32 %v1933_v6, %v1082_v18  ;;  %v1120_v63 = vsel %vm345_vm9, %v2521_v19, -inf }
 0xad9   :  { %v1117_v21 = vpop.f32.mrf.mxu0 }
 0xada   :  { %v1118_v59 = vadd.f32 %v1933_v6, %v1117_v21  ;;  %v1135_v60 = vsel %vm345_vm9, %v1083_v20, -inf }
 0xadb   :  { %1136 = vmax.xlane.f32.xlu2 %v1135_v60 }
 0xadc   :  { %v1141_v22 = vsel %vm345_vm9, %v1118_v59, -inf }
 0xadd   :  { %1142 = vmax.xlane.f32.xlu0 %v1141_v22  ;;  %v1012_v23 = vpop.f32.mrf.mxu1  ;;  %1121 = vmax.xlane.f32.xlu1 %v1120_v63 }
 0xade   :  { %v1013_v62 = vadd.f32 %v1933_v6, %v1012_v23  ;;  %v1829_v6 = vpack.i.bf16 %v2469_v44, %v2473_v45 }
 0xae0   :  { %v1123_v42 = vsel %vm345_vm9, %v1013_v62, -inf }
 0xae5   :  { %1124 = vmax.xlane.f32.xlu0 %v1123_v42 }
 0xb3a   :  { %v1128_v5 = vpop.xlane.xlu1 %1127 }
 0xb3b   :  { %v1146_v56 = vsub.f32 %v1045_v2, %v1128_v5 }
 0xb3d   :  { %v1156_v58 = vmul.f32 1.442695, %v1146_v56 }
 0xb3f   :  { %1892 = vpow2.f32 %v1156_v58 }
 0xb42   :  { %v1131_v27 = vpop.xlane.xlu0 %1130 }
 0xb43   :  { %v1147_v53 = vsub.f32 %v1048_v50, %v1131_v27  ;;  %v1834_v50 = vpack.i.bf16 %v2485_v47, %v2483_v46 }
 0xb45   :  { %v2528_v1 = vpop.eup %1892  ;;  %v1158_v55 = vmul.f32 1.442695, %v1147_v53 }
 0xb46   :  { %v1134_v24 = vpop.xlane.xlu2 %1133  ;;  %v1174_v25 = vsel %vm345_vm9, %v2528_v1, 0.0 }
 0xb47   :  { %v1148_v26 = vsub.f32 %v1080_v12, %v1134_v24  ;;  %1175 = vadd.xlane.f32.xlu2 %v1174_v25  ;;  %v1839_v12 = vpack.i.bf16 %v2449_v39, %v2453_v41 }
 0xb48   :  { %v1140_v28 = vpop.xlane.xlu1 %1139 }
 0xb49   :  { %v1160_v31 = vmul.f32 1.442695, %v1148_v26  ;;  %v1150_v32 = vsub.f32 %v1115_v9, %v1140_v28 }
 0xb4b   :  { %1894 = vpow2.f32 %v1160_v31  ;;  %v1164_v33 = vmul.f32 1.442695, %v1150_v32 }
 0xb4d   :  { %1896 = vpow2.f32 %v1164_v33 }
 0xb4e   :  { %v1137_v34 = vpop.xlane.xlu2 %1136 }
 0xb4f   :  { %v1149_v35 = vsub.f32 %v1083_v20, %v1137_v34 }
 0xb50   :  { %v1143_v37 = vpop.xlane.xlu0 %1142  ;;  %v1122_v7 = vpop.xlane.xlu1 %1121 }
 0xb51   :  { %v2532_v11 = vpop.eup %1894  ;;  %v1162_v38 = vmul.f32 1.442695, %v1149_v35  ;;  %v1151_v40 = vsub.f32 %v1118_v59, %v1143_v37  ;;  %v1144_v8 = vsub.f32 %v2521_v19, %v1122_v7 }
 0xb52   :  { %v1180_v48 = vsel %vm345_vm9, %v2532_v11, 0.0 }
 0xb53   :  { %v2536_v49 = vpop.eup %1896  ;;  %1898 = vpow2.f32 %v1162_v38  ;;  %v1166_v51 = vmul.f32 1.442695, %v1151_v40  ;;  %1181 = vadd.xlane.f32.xlu1 %v1180_v48  ;;  %v1152_v13 = vmul.f32 1.442695, %v1144_v8 }
 0xb54   :  { %v1186_v0 = vsel %vm345_vm9, %v2536_v49, 0.0 }
 0xb55   :  { %1187 = vadd.xlane.f32.xlu0 %v1186_v0  ;;  %1900 = vpow2.f32 %v1166_v51 }
 0xb56   :  { %1902 = vpow2.f32 %v1158_v55 }
 0xb57   :  { %1904 = vpow2.f32 %v1152_v13 }
 0xb58   :  { %v1125_v43 = vpop.xlane.xlu0 %1124 }
 0xb59   :  { %v2540_v30 = vpop.eup %1898  ;;  %v1145_v14 = vsub.f32 %v1013_v62, %v1125_v43 }
 0xb5a   :  { %v1183_v57 = vsel %vm345_vm9, %v2540_v30, 0.0 }
 0xb5b   :  { %1184 = vadd.xlane.f32.xlu1 %v1183_v57  ;;  %v2544_v36 = vpop.eup %1900  ;;  %v1154_v45 = vmul.f32 1.442695, %v1145_v14 }
 0xb5c   :  { %v1189_v29 = vsel %vm345_vm9, %v2544_v36, 0.0  ;;  %v2548_v2 = vpop.eup %1902 }
 0xb5d   :  { %1190 = vadd.xlane.f32.xlu2 %v1189_v29  ;;  %v1177_v3 = vsel %vm345_vm9, %v2548_v2, 0.0  ;;  %v2565_v44 = vpop.eup %1904  ;;  %1906 = vpow2.f32 %v1154_v45 }
 0xb5e   :  { %v1168_v46 = vsel %vm345_vm9, %v2565_v44, 0.0 }
 0xb63   :  { %v2569_v47 = vpop.eup %1906 }
 0xb64   :  { %v1171_v9 = vsel %vm345_vm9, %v2569_v47, 0.0 }
 0xb65   :  { %1178 = vadd.xlane.f32.xlu2 %v1177_v3 }
 0xb69   :  { %1825 = vrot.lane.b32.xlu0 %v1824_v4, %s2046_s9 }
 0xb74   :  { %1830 = vrot.lane.b32.xlu1 %v1829_v6, %s2046_s9 }
 0xb7d   :  { %1835 = vrot.lane.b32.xlu2 %v1834_v50, %s2046_s9 }
 0xb85   :  { %1840 = vrot.lane.b32.xlu2 %v1839_v12, %s2046_s9 }
 0xb93   :  { %1169 = vadd.xlane.f32.xlu0 %v1168_v46 }
 0xb9e   :  { %1172 = vadd.xlane.f32.xlu1 %v1171_v9 }
 0xbba   :  { %v1176_v39 = vpop.xlane.xlu2 %1175 }
 0xbbb   :  { %1908 = vrcp.f32 %v1176_v39  ;;  %v1233_v62 = vand.u32 2147483648, %v1176_v39  ;;  %vm1227_vm4 = vweird.f32 %v1176_v39  ;;  %v1231_v25 = vand.u32 2147483647, %v1176_v39 }
 0xbbd   :  { %v1234_v26 = vor.u32 1.1754944e-38, %v1233_v62  ;;  %vm1232_vm7 = vcmp.eq.f32.partialorder %v1231_v25, 8.507059e+37 }
 0xbc1   :  { %v1909_v15 = vpop.eup %1908 }
 0xbc2   :  { %v1223_v17 = vmul.f32 %v1909_v15, %v1176_v39  ;;  %vm1228_vm3 = vweird.f32 %v1909_v15 }
 0xbc3   :  { %vm2590_vm5 = vmor %vm1227_vm4, %vm1228_vm3 }
 0xbc4   :  { %v1224_v21 = vsub.f32 1.0, %v1223_v17 }
 0xbc6   :  { %v1182_v41 = vpop.xlane.xlu1 %1181  ;;  %v1225_v63 = vmul.f32 %v1909_v15, %v1224_v21 }
 0xbc7   :  { %1910 = vrcp.f32 %v1182_v41  ;;  %v1261_v33 = vand.u32 2147483647, %v1182_v41  ;;  %v1263_v48 = vand.u32 2147483648, %v1182_v41  ;;  %vm1257_vm14 = vweird.f32 %v1182_v41 }
 0xbc8   :  { %v1188_v16 = vpop.xlane.xlu0 %1187  ;;  %v1226_v56 = vadd.f32 %v1909_v15, %v1225_v63 }
 0xbc9   :  { %1912 = vrcp.f32 %v1188_v16  ;;  %v1293_v51 = vand.u32 2147483648, %v1188_v16  ;;  %vm1287_vm11 = vweird.f32 %v1188_v16  ;;  %v1291_v55 = vand.u32 2147483647, %v1188_v16 }
 0xbca   :  { %v1230_v35 = vsel %vm2590_vm5, %v1909_v15, %v1226_v56  ;;  %vm2611_vm15 = vcmp.eq.f32.partialorder %v1261_v33, 8.507059e+37  ;;  %v1264_v12 = vor.u32 1.1754944e-38, %v1263_v48 }
 0xbcb   :  { %v1235_v57 = vsel %vm1232_vm7, %v1234_v26, %v1230_v35  ;;  %v1294_v13 = vor.u32 1.1754944e-38, %v1293_v51  ;;  %vm1292_vm3 = vcmp.eq.f32.partialorder %v1291_v55, 8.507059e+37 }
 0xbcc   :  { %v1236_v46 = vmul.f32 %v2528_v1, %v1235_v57 }
 0xbcd   :  { %v2573_v18 = vpop.eup %1910 }
 0xbce   :  { %v2575_v19 = vpop.xlane.xlu1 %1184  ;;  %v1253_v22 = vmul.f32 %v2573_v18, %v1182_v41  ;;  %vm1258_vm12 = vweird.f32 %v2573_v18 }
 0xbcf   :  { %v1913_v20 = vpop.eup %1912  ;;  %1914 = vrcp.f32 %v2575_v19  ;;  %vm2615_vm2 = vmor %vm1257_vm14, %vm1258_vm12  ;;  %vm1272_vm4 = vweird.f32 %v2575_v19  ;;  %v1276_v56 = vand.u32 2147483647, %v2575_v19 }
 0xbd0   :  { %v1283_v59 = vmul.f32 %v1913_v20, %v1188_v16  ;;  %v2578_v60 = vpop.xlane.xlu2 %1190  ;;  %v1254_v42 = vsub.f32 1.0, %v1253_v22  ;;  %vm1288_vm6 = vweird.f32 %v1913_v20  ;;  %v1278_v16 = vand.u32 2147483648, %v2575_v19 }
 0xbd1   :  { %1916 = vrcp.f32 %v2578_v60  ;;  %vm2602_vm13 = vmor %vm1287_vm11, %vm1288_vm6  ;;  %vm1302_vm6 = vweird.f32 %v2578_v60  ;;  %v1308_v21 = vand.u32 2147483648, %v2578_v60 }
 0xbd2   :  { %v1284_v23 = vsub.f32 1.0, %v1283_v59  ;;  %v1255_v32 = vmul.f32 %v2573_v18, %v1254_v42  ;;  %v1306_v59 = vand.u32 2147483647, %v2578_v60  ;;  %v1279_v35 = vor.u32 1.1754944e-38, %v1278_v16 }
 0xbd4   :  { %v1285_v58 = vmul.f32 %v1913_v20, %v1284_v23  ;;  %v1256_v29 = vadd.f32 %v2573_v18, %v1255_v32 }
 0xbd5   :  { %v2582_v5 = vpop.eup %1914 }
 0xbd6   :  { %v1268_v34 = vmul.f32 %v2582_v5, %v2575_v19  ;;  %v1286_v37 = vadd.f32 %v1913_v20, %v1285_v58  ;;  %v1260_v9 = vsel %vm2615_vm2, %v2573_v18, %v1256_v29  ;;  %vm1273_vm7 = vweird.f32 %v2582_v5 }
 0xbd7   :  { %v2584_v24 = vpop.eup %1916  ;;  %v1265_v18 = vsel %vm2611_vm15, %v1264_v12, %v1260_v9  ;;  %vm2658_vm14 = vmor %vm1272_vm4, %vm1273_vm7  ;;  %vm1307_vm15 = vcmp.eq.f32.partialorder %v1306_v59, 8.507059e+37  ;;  %vm1277_vm4 = vcmp.eq.f32.partialorder %v1276_v56, 8.507059e+37 }
 0xbd8   :  { %v1298_v27 = vmul.f32 %v2584_v24, %v2578_v60  ;;  %v2588_v28 = vpop.xlane.xlu2 %1178  ;;  %v1269_v4 = vsub.f32 1.0, %v1268_v34  ;;  %v1290_v6 = vsel %vm2602_vm13, %v1913_v20, %v1286_v37  ;;  %vm1303_vm5 = vweird.f32 %v2584_v24 }
 0xbd9   :  { %1918 = vrcp.f32 %v2588_v28  ;;  %v1295_v39 = vsel %vm1292_vm3, %v1294_v13, %v1290_v6  ;;  %v1248_v23 = vand.u32 2147483648, %v2588_v28  ;;  %vm2639_vm11 = vmor %vm1302_vm6, %vm1303_vm5  ;;  %vm1242_vm13 = vweird.f32 %v2588_v28 }
 0xbda   :  { %v1299_v38 = vsub.f32 1.0, %v1298_v27  ;;  %v1270_v41 = vmul.f32 %v2582_v5, %v1269_v4  ;;  %v1296_v63 = vmul.f32 %v2536_v49, %v1295_v39  ;;  %v1309_v27 = vor.u32 1.1754944e-38, %v1308_v21 }
 0xbdb   :  { %v1826_v40 = vpop.permute.xlu0 %1825  ;;  %v1266_v31 = vmul.f32 %v2532_v11, %v1265_v18  ;;  %v1246_v32 = vand.u32 2147483647, %v2588_v28  ;;  %v1249_v37 = vor.u32 1.1754944e-38, %v1248_v23  ;;  %v1744_v18 = vld [vmem:[%s2796_s3 + $0x30] sm:$0xff] }
 0xbdc   :  { %v1828_v53 = vunpack.i.h.bf16 %v1826_v40  ;;  %v1827_v0 = vunpack.i.l.bf16 %v1826_v40  ;;  %v1300_v50 = vmul.f32 %v2584_v24, %v1299_v38  ;;  %v1271_v60 = vadd.f32 %v2582_v5, %v1270_v41 }
 0xbdd   :  { %vm1247_vm3 = vcmp.eq.f32.partialorder %v1246_v32, 8.507059e+37 }
 0xbde   :  { %1373 = vmatpush.msra.mxu2 %v1827_v0  ;;  %1408 = vmatpush.msra.mxu3 %v1828_v53  ;;  %v1301_v20 = vadd.f32 %v2584_v24, %v1300_v50  ;;  %v1275_v19 = vsel %vm2658_vm14, %v2582_v5, %v1271_v60 }
 0xbdf   :  { %v2609_v7 = vpop.eup %1918  ;;  %v1280_v51 = vsel %vm1277_vm4, %v1279_v35, %v1275_v19 }
 0xbe0   :  { %v1238_v14 = vmul.f32 %v2609_v7, %v2588_v28  ;;  %v1836_v45 = vpop.permute.xlu2 %1835  ;;  %vm1243_vm12 = vweird.f32 %v2609_v7  ;;  %v1305_v49 = vsel %vm2639_vm11, %v2584_v24, %v1301_v20  ;;  %v1281_v0 = vmul.f32 %v2540_v30, %v1280_v51 }
 0xbe1   :  { %v1837_v15 = vunpack.i.l.bf16 %v1836_v45  ;;  %v1838_v1 = vunpack.i.h.bf16 %v1836_v45  ;;  %vm1244_vm2 = vmor %vm1242_vm13, %vm1243_vm12  ;;  %v1310_v11 = vsel %vm1307_vm15, %v1309_v27, %v1305_v49 }
 0xbe2   :  { %v1239_v17 = vsub.f32 1.0, %v1238_v14  ;;  %v1311_v40 = vmul.f32 %v2544_v36, %v1310_v11 }
 0xbe3   :  { %1443 = vmatpush.msrb.mxu0 %v1837_v15 }
 0xbe4   :  { %v1240_v22 = vmul.f32 %v2609_v7, %v1239_v17 }
 0xbe5   :  { %1444 = vmatpush.msrb.mxu0 %v1838_v1 }
 0xbe6   :  { %v1831_v62 = vpop.permute.xlu1 %1830  ;;  %1782 = vmatmul.msk.f32.vlgmr.msrb.gmra.mxu0 %vm345_vm9, %v1296_v63  ;;  %v1241_v26 = vadd.f32 %v2609_v7, %v1240_v22  ;;  %v1743_v22 = vld [vmem:[%s2796_s3 + $0x28] sm:$0xff]  ;;  %v1742_v63 = vld [vmem:[%s2796_s3 + $0x20] sm:$0xff] }
 0xbe7   :  { %v1833_v58 = vunpack.i.h.bf16 %v1831_v62  ;;  %v1832_v25 = vunpack.i.l.bf16 %v1831_v62 }
 0xbe8   :  { %v1841_v34 = vpop.permute.xlu2 %1840  ;;  %v1245_v28 = vsel %vm1244_vm2, %v2609_v7, %v1241_v26 }
 0xbe9   :  { %1374 = vmatpush.msra.mxu2 %v1832_v25  ;;  %1409 = vmatpush.msra.mxu3 %v1833_v58  ;;  %v1842_v24 = vunpack.i.l.bf16 %v1841_v34  ;;  %v1843_v38 = vunpack.i.h.bf16 %v1841_v34  ;;  %v1250_v48 = vsel %vm1247_vm3, %v1249_v37, %v1245_v28 }
 0xbea   :  { %1778 = vmatmul.msk.f32.vlgmr.msra.gmra.mxu2 %vm345_vm9, %v1236_v46  ;;  %1780 = vmatmul.msk.f32.vlgmr.msra.gmra.mxu3 %vm345_vm9, %v1266_v31  ;;  %v1251_v53 = vmul.f32 %v2548_v2, %v1250_v48 }
 0xbeb   :  { %1338 = vmatpush.msra.mxu1 %v1842_v24  ;;  %v1513_v24 = vperm.slane %v2442_v61, 4 }
 0xbed   :  { %1339 = vmatpush.msra.mxu1 %v1843_v38 }
 0xbee   :  { %1783 = vmatmul.msk.f32.gmra.mxu0 %vm345_vm9, %v1311_v40 }
 0xbf2   :  { %1779 = vmatmul.msk.f32.gmra.mxu2 %vm345_vm9, %v1251_v53  ;;  %1781 = vmatmul.msk.f32.gmra.mxu3 %vm345_vm9, %v1281_v0 }
 0xc06   :  { %v1170_v5 = vpop.xlane.xlu0 %1169 }
 0xc07   :  { %1920 = vrcp.f32 %v1170_v5  ;;  %v1203_v3 = vand.u32 2147483648, %v1170_v5  ;;  %v1201_v6 = vand.u32 2147483647, %v1170_v5  ;;  %vm1197_vm6 = vweird.f32 %v1170_v5 }
 0xc09   :  { %v1204_v2 = vor.u32 1.1754944e-38, %v1203_v3  ;;  %vm1202_vm11 = vcmp.eq.f32.partialorder %v1201_v6, 8.507059e+37  ;;  %v1747_v6 = vld [vmem:[%s2797_s4 + $0x28] sm:$0xff] }
 0xc0d   :  { %v1921_v55 = vpop.eup %1920 }
 0xc0e   :  { %v1193_v57 = vmul.f32 %v1921_v55, %v1170_v5  ;;  %vm1198_vm5 = vweird.f32 %v1921_v55 }
 0xc0f   :  { %vm1199_vm7 = vmor %vm1197_vm6, %vm1198_vm5 }
 0xc10   :  { %v1194_v29 = vsub.f32 1.0, %v1193_v57 }
 0xc11   :  { %v1173_v36 = vpop.xlane.xlu1 %1172 }
 0xc12   :  { %v1195_v4 = vmul.f32 %v1921_v55, %v1194_v29  ;;  %1922 = vrcp.f32 %v1173_v36  ;;  %v1218_v14 = vand.u32 2147483648, %v1173_v36  ;;  %v1216_v46 = vand.u32 2147483647, %v1173_v36 }
 0xc13   :  { %vm1212_vm13 = vweird.f32 %v1173_v36 }
 0xc14   :  { %v1196_v50 = vadd.f32 %v1921_v55, %v1195_v4  ;;  %v1219_v39 = vor.u32 1.1754944e-38, %v1218_v14  ;;  %vm1217_vm15 = vcmp.eq.f32.partialorder %v1216_v46, 8.507059e+37  ;;  %v1748_v4 = vld [vmem:[%s2797_s4 + $0x30] sm:$0xff]  ;;  %v1560_v46 = vperm.slane %v2442_v61, 2 }
 0xc16   :  { %v1200_v30 = vsel %vm1199_vm7, %v1921_v55, %v1196_v50  ;;  %v1746_v50 = vld [vmem:[%s2797_s4 + $0x20] sm:$0xff] }
 0xc17   :  { %v1205_v7 = vsel %vm1202_vm11, %v1204_v2, %v1200_v30 }
 0xc18   :  { %v1923_v8 = vpop.eup %1922  ;;  %v1206_v12 = vmul.f32 %v2565_v44, %v1205_v7 }
 0xc19   :  { %v1208_v13 = vmul.f32 %v1923_v8, %v1173_v36  ;;  %vm1213_vm12 = vweird.f32 %v1923_v8  ;;  %v1749_v36 = vld [vmem:[%s2797_s4 + $0x38] sm:$0xff] }
 0xc1a   :  { %1776 = vmatmul.msk.f32.vlgmr.msra.gmra.mxu1 %vm345_vm9, %v1206_v12  ;;  %vm1214_vm14 = vmor %vm1212_vm13, %vm1213_vm12  ;;  %1585 = vmatpush.msrb.mxu2 %v1749_v36 }
 0xc1b   :  { %v1209_v43 = vsub.f32 1.0, %v1208_v13 }
 0xc1c   :  { %1586 = vmatpush.msrb.mxu2 %v1748_v4 }
 0xc1d   :  { %v1210_v45 = vmul.f32 %v1923_v8, %v1209_v43 }
 0xc1e   :  { %1587 = vmatpush.msrb.mxu2 %v1747_v6 }
 0xc1f   :  { %v1211_v9 = vadd.f32 %v1923_v8, %v1210_v45 }
 0xc20   :  { %1588 = vmatpush.msrb.mxu2 %v1746_v50 }
 0xc21   :  { %v1215_v41 = vsel %vm1214_vm14, %v1923_v8, %v1211_v9  ;;  %v1757_v9 = vld [vmem:[%s2798_s5 + $0x78] sm:$0xff] }
 0xc22   :  { %v1220_v15 = vsel %vm1217_vm15, %v1219_v39, %v1215_v41  ;;  %v1756_v39 = vld [vmem:[%s2798_s5 + $0x70] sm:$0xff]  ;;  %1612 = vmatpush.msrb.mxu3 %v1757_v9 }
 0xc23   :  { %v1221_v16 = vmul.f32 %v2569_v47, %v1220_v15  ;;  %v1745_v47 = vld [vmem:[%s2796_s3 + $0x38] sm:$0xff] }
 0xc24   :  { %1500 = vmatpush.msrb.mxu1 %v1745_v47  ;;  %1613 = vmatpush.msrb.mxu3 %v1756_v39  ;;  %v1845_v39 = vld [vmem:[%s2800_s7 + $0x1] ss:$0 sm:$0xff] }
 0xc25   :  { %1777 = vmatmul.msk.f32.gmra.mxu1 %vm345_vm9, %v1221_v16  ;;  %v1563_v16 = vperm.slane %v2442_v61, 3 }
 0xc26   :  { %1501 = vmatpush.msrb.mxu1 %v1744_v18  ;;  %v1753_v18 = vld [vmem:[%s2798_s5 + $0x58] sm:$0xff] }
 0xc28   :  { %1502 = vmatpush.msrb.mxu1 %v1743_v22 }
 0xc2a   :  { %1503 = vmatpush.msrb.mxu1 %v1742_v63 }
 0xc63   :  { %v1446_v44 = vpop.f32.mrf.mxu0 }
 0xc64   :  { %1470 = vrot.lane.b32.xlu2 %v1446_v44, %s2047_s10  ;;  %v1755_v44 = vld [vmem:[%s2798_s5 + $0x68] sm:$0xff] }
 0xc65   :  { %1614 = vmatpush.msrb.mxu3 %v1755_v44 }
 0xc6b   :  { %v1449_v17 = vpop.f32.mrf.mxu0 }
 0xc6c   :  { %1472 = vrot.lane.b32.xlu1 %v1449_v17, %s2047_s10 }
 0xc6d   :  { %v1376_v20 = vpop.f32.mrf.mxu2  ;;  %v1411_v21 = vpop.f32.mrf.mxu3 }
 0xc6e   :  { %1454 = vrot.lane.b32.xlu2 %v1376_v20, %s2038_s14 }
 0xc75   :  { %v1414_v1 = vpop.f32.mrf.mxu3  ;;  %v1379_v59 = vpop.f32.mrf.mxu2 }
 0xc76   :  { %1464 = vrot.lane.b32.xlu0 %v1414_v1, %s2048_s11  ;;  %1462 = vrot.lane.b32.xlu2 %v1411_v21, %s2048_s11  ;;  %v1754_v1 = vld [vmem:[%s2798_s5 + $0x60] sm:$0xff] }
 0xc77   :  { %1615 = vmatpush.msrb.mxu3 %v1754_v1 }
 0xc79   :  { %1616 = vmatpush.msrb.mxu3 %v1753_v18 }
 0xc7e   :  { %1456 = vrot.lane.b32.xlu2 %v1379_v59, %s2038_s14 }
 0xc97   :  { %v1341_v42 = vpop.f32.mrf.mxu1 }
 0xca2   :  { %v1344_v26 = vpop.f32.mrf.mxu1 }
 0xcbe   :  { %v1471_v23 = vpop.permute.xlu2 %1470 }
 0xcc8   :  { %v1455_v62 = vpop.permute.xlu2 %1454 }
 0xcc9   :  { %v1476_v60 = vsel %vm208_vm8, %v1341_v42, %v1455_v62 }
 0xcd0   :  { %v1463_v56 = vpop.permute.xlu2 %1462 }
 0xcd1   :  { %v1478_v58 = vsel %vm345_vm9, %v1476_v60, %v1463_v56 }
 0xcd2   :  { %v1480_v25 = vsel %vm706_vm1, %v1478_v58, %v1471_v23 }
 0xcd3   :  { %1784 = vmatmul.msk.f32.vlgmr.msrb.gmra.mxu1 %vm102_vm0, %v1480_v25 }
 0xcd8   :  { %v1457_v49 = vpop.permute.xlu2 %1456 }
 0xcd9   :  { %v1477_v27 = vsel %vm208_vm8, %v1344_v26, %v1457_v49  ;;  %v1752_v26 = vld [vmem:[%s2798_s5 + $0x50] sm:$0xff] }
 0xcda   :  { %1617 = vmatpush.msrb.mxu3 %v1752_v26 }
 0xcde   :  { %v1473_v32 = vpop.permute.xlu1 %1472 }
 0xce8   :  { %v1465_v31 = vpop.permute.xlu0 %1464 }
 0xce9   :  { %v1479_v33 = vsel %vm345_vm9, %v1477_v27, %v1465_v31  ;;  %v1751_v27 = vld [vmem:[%s2798_s5 + $0x48] sm:$0xff]  ;;  %v1750_v31 = vld [vmem:[%s2798_s5 + $0x40] sm:$0xff] }
 0xcea   :  { %v1481_v34 = vsel %vm706_vm1, %v1479_v33, %v1473_v32  ;;  %1618 = vmatpush.msrb.mxu3 %v1751_v27  ;;  %v1566_v32 = vperm.slane %v2442_v61, 7 }
 0xceb   :  { %1785 = vmatmul.msk.f32.gmra.mxu1 %vm102_vm0, %v1481_v34 }
 0xcec   :  { %1619 = vmatpush.msrb.mxu3 %v1750_v31 }
 0xd50   :  { %v1505_v11 = vpop.f32.mrf.mxu1 }
 0xd51   :  { %v1511_v28 = vadd.f32 %v1505_v11, %v2413_v52 }
 0xd53   :  { %v2708_v19 = vadd.f32 %v1513_v24, %v1511_v28 }
 0xd55   :  { %v1516_v35 = vsel %vm102_vm0, %v2708_v19, 0.0 }
 0xd56   :  { %1517 = vadd.xlane.f32.xlu2 %v1516_v35 }
 0xd68   :  { %v1508_v37 = vpop.f32.mrf.mxu1 }
 0xd69   :  { %v1512_v38 = vadd.f32 %v1508_v37, %v2418_v54  ;;  %v1629_v37 = vperm.slane %v2442_v61, 5 }
 0xd6b   :  { %v2713_v40 = vadd.f32 %v1513_v24, %v1512_v38 }
 0xd6d   :  { %v1519_v48 = vsel %vm102_vm0, %v2713_v40, 0.0 }
 0xd6e   :  { %1520 = vadd.xlane.f32.xlu0 %v1519_v48 }
 0xdc9   :  { %v1518_v51 = vpop.xlane.xlu2 %1517 }
 0xdca   :  { %v1522_v53 = vmul.f32 %v1518_v51, %v2121_v10 }
 0xdcc   :  { %v1524_v52 = vsub.f32 %v2708_v19, %v1522_v53 }
 0xdce   :  { %v1526_v0 = vmul.f32 %v1524_v52, %v1524_v52 }
 0xdd0   :  { %v1528_v5 = vsel %vm102_vm0, %v1526_v0, 0.0 }
 0xdd1   :  { %1529 = vadd.xlane.f32.xlu1 %v1528_v5 }
 0xde1   :  { %v1521_v55 = vpop.xlane.xlu0 %1520 }
 0xde2   :  { %v1523_v57 = vmul.f32 %v1521_v55, %v2121_v10 }
 0xde4   :  { %v1525_v54 = vsub.f32 %v2713_v40, %v1523_v57 }
 0xde6   :  { %v1527_v29 = vmul.f32 %v1525_v54, %v1525_v54 }
 0xde8   :  { %v1531_v3 = vsel %vm102_vm0, %v1527_v29, 0.0 }
 0xde9   :  { %1532 = vadd.xlane.f32.xlu2 %v1531_v3 }
 0xe44   :  { %v1530_v2 = vpop.xlane.xlu1 %1529 }
 0xe45   :  { %v1534_v30 = vmul.f32 %v1530_v2, %v2121_v10 }
 0xe47   :  { %v1536_v7 = vadd.f32 1e-05, %v1534_v30 }
 0xe49   :  { %1924 = vrsqrt.f32 %v1536_v7  ;;  %vm1544_vm9 = vweird.f32 %v1536_v7 }
 0xe4f   :  { %v1925_v8 = vpop.eup %1924 }
 0xe50   :  { %v1539_v12 = vmul.f32 %v1925_v8, %v1536_v7  ;;  %vm1545_vm8 = vweird.f32 %v1925_v8 }
 0xe51   :  { %vm1546_vm1 = vmor %vm1544_vm9, %vm1545_vm8 }
 0xe52   :  { %v1540_v13 = vmul.f32 %v1925_v8, %v1539_v12 }
 0xe54   :  { %v1541_v43 = vmul.f32 0.5, %v1540_v13 }
 0xe56   :  { %v1542_v14 = vsub.f32 1.5, %v1541_v43 }
 0xe58   :  { %v1543_v45 = vmul.f32 %v1925_v8, %v1542_v14 }
 0xe5a   :  { %v1547_v41 = vsel %vm1546_vm1, %v1925_v8, %v1543_v45  ;;  %v1844_v45 = vld [vmem:[%s2800_s7] ss:$0 sm:$0xff]  ;;  %s2049_s7 = smov [#allocation8]  }
 0xe5b   :  { %v1558_v15 = vmul.f32 %v1547_v41, %v1524_v52  ;;  %s1690_s6 = sshll.u32 %s2049_s7, 4  ;;  %s1691_s6 = int_to_ptr.vmem [resolvable:$true] %s1690_s6 }
 0xe5c   :  { %v1533_v17 = vpop.xlane.xlu2 %1532 }
 0xe5d   :  { %v1561_v20 = vmul.f32 %v1560_v46, %v1558_v15  ;;  %v1535_v21 = vmul.f32 %v1533_v17, %v2121_v10 }
 0xe5f   :  { %v1537_v59 = vadd.f32 1e-05, %v1535_v21  ;;  %v1564_v47 = vadd.f32 %v1563_v16, %v1561_v20 }
 0xe61   :  { %1926 = vrsqrt.f32 %v1537_v59  ;;  %1786 = vmatmul.msk.f32.vlgmr.msrb.gmra.mxu2 %vm102_vm0, %v1564_v47  ;;  %vm1554_vm3 = vweird.f32 %v1537_v59 }
 0xe67   :  { %v1927_v22 = vpop.eup %1926 }
 0xe68   :  { %v1549_v63 = vmul.f32 %v1927_v22, %v1537_v59  ;;  %vm1555_vm2 = vweird.f32 %v1927_v22 }
 0xe69   :  { %vm1556_vm4 = vmor %vm1554_vm3, %vm1555_vm2 }
 0xe6a   :  { %v1550_v23 = vmul.f32 %v1927_v22, %v1549_v63 }
 0xe6c   :  { %v1551_v62 = vmul.f32 0.5, %v1550_v23 }
 0xe6e   :  { %v1552_v42 = vsub.f32 1.5, %v1551_v62 }
 0xe70   :  { %v1553_v60 = vmul.f32 %v1927_v22, %v1552_v42 }
 0xe72   :  { %v1557_v56 = vsel %vm1556_vm4, %v1927_v22, %v1553_v60 }
 0xe73   :  { %v1559_v58 = vmul.f32 %v1557_v56, %v1525_v54 }
 0xe75   :  { %v1562_v25 = vmul.f32 %v1560_v46, %v1559_v58 }
 0xe77   :  { %v1565_v49 = vadd.f32 %v1563_v16, %v1562_v25 }
 0xe79   :  { %1787 = vmatmul.msk.f32.gmra.mxu2 %vm102_vm0, %v1565_v49 }
 0xee4   :  { %v1590_v33 = vpop.f32.mrf.mxu2 }
 0xee5   :  { %v1591_v34 = vadd.f32 %v1590_v33, %v1566_v32 }
 0xee7   :  { %v1596_v24 = vmax.f32 %v1591_v34, 0.0 }
 0xee9   :  { %1788 = vmatmul.msk.f32.vlgmr.msrb.gmra.mxu3 %vm825_vm10, %v1596_v24 }
 0xefc   :  { %v1593_v11 = vpop.f32.mrf.mxu2 }
 0xefd   :  { %v1594_v28 = vadd.f32 %v1593_v11, %v1566_v32 }
 0xeff   :  { %v1597_v35 = vmax.f32 %v1594_v28, 0.0 }
 0xf01   :  { %1789 = vmatmul.msk.f32.gmra.mxu3 %vm825_vm10, %v1597_v35 }
 0xf6c   :  { %v1621_v38 = vpop.f32.mrf.mxu3 }
 0xf6d   :  { %v1627_v48 = vadd.f32 %v1621_v38, %v2708_v19 }
 0xf6f   :  { %v1630_v51 = vadd.f32 %v1629_v37, %v1627_v48 }
 0xf71   :  { %v1634_v53 = vsel %vm102_vm0, %v1630_v51, 0.0 }
 0xf72   :  { %1635 = vadd.xlane.f32.xlu2 %v1634_v53 }
 0xf84   :  { %v1624_v52 = vpop.f32.mrf.mxu3 }
 0xf85   :  { %v1628_v0 = vadd.f32 %v1624_v52, %v2713_v40 }
 0xf87   :  { %v1631_v5 = vadd.f32 %v1629_v37, %v1628_v0 }
 0xf89   :  { %v1637_v55 = vsel %vm102_vm0, %v1631_v5, 0.0 }
 0xf8a   :  { %1638 = vadd.xlane.f32.xlu0 %v1637_v55 }
 0xfe5   :  { %v1636_v57 = vpop.xlane.xlu2 %1635 }
 0xfe6   :  { %v1640_v54 = vmul.f32 %v1636_v57, %v2121_v10 }
 0xfe8   :  { %v1642_v29 = vsub.f32 %v1630_v51, %v1640_v54 }
 0xfea   :  { %v1644_v3 = vmul.f32 %v1642_v29, %v1642_v29 }
 0xfec   :  { %v1646_v61 = vsel %vm102_vm0, %v1644_v3, 0.0 }
 0xfed   :  { %1647 = vadd.xlane.f32.xlu2 %v1646_v61 }
 0xffd   :  { %v1639_v19 = vpop.xlane.xlu0 %1638 }
 0xffe   :  { %v1641_v36 = vmul.f32 %v1639_v19, %v2121_v10 }
0x1000   :  { %v1643_v4 = vsub.f32 %v1631_v5, %v1641_v36 }
0x1002   :  { %v1645_v6 = vmul.f32 %v1643_v4, %v1643_v4 }
0x1004   :  { %v1649_v50 = vsel %vm102_vm0, %v1645_v6, 0.0 }
0x1005   :  { %1650 = vadd.xlane.f32.xlu0 %v1649_v50 }
0x1060   :  { %v1648_v40 = vpop.xlane.xlu2 %1647 }
0x1061   :  { %v1652_v2 = vmul.f32 %v1648_v40, %v2121_v10 }
0x1063   :  { %v1654_v30 = vadd.f32 1e-05, %v1652_v2 }
0x1065   :  { %1928 = vrsqrt.f32 %v1654_v30  ;;  %vm1662_vm5 = vweird.f32 %v1654_v30 }
0x106b   :  { %v1929_v7 = vpop.eup %1928 }
0x106c   :  { %v1657_v8 = vmul.f32 %v1929_v7, %v1654_v30  ;;  %vm1663_vm10 = vweird.f32 %v1929_v7 }
0x106d   :  { %vm1664_vm6 = vmor %vm1662_vm5, %vm1663_vm10 }
0x106e   :  { %v1658_v12 = vmul.f32 %v1929_v7, %v1657_v8 }
0x1070   :  { %v1659_v13 = vmul.f32 0.5, %v1658_v12 }
0x1072   :  { %v1660_v43 = vsub.f32 1.5, %v1659_v13 }
0x1074   :  { %v1661_v14 = vmul.f32 %v1929_v7, %v1660_v43 }
0x1076   :  { %v1665_v46 = vsel %vm1664_vm6, %v1929_v7, %v1661_v14 }
0x1077   :  { %v1676_v9 = vmul.f32 %v1665_v46, %v1642_v29 }
0x1078   :  { %v1651_v41 = vpop.xlane.xlu0 %1650 }
0x1079   :  { %v1679_v15 = vmul.f32 %v1844_v45, %v1676_v9  ;;  %v1653_v16 = vmul.f32 %v1651_v41, %v2121_v10 }
0x107b   :  { %v1655_v44 = vadd.f32 1e-05, %v1653_v16  ;;  %v1682_v17 = vadd.f32 %v1845_v39, %v1679_v15 }
0x107d   :  { %1930 = vrsqrt.f32 %v1655_v44  ;;  %1684 = vst.msk [vmem:[#allocation8] sm:$0xff] %vm102_vm0, %v1682_v17  ;;  %vm1672_vm11 = vweird.f32 %v1655_v44 }
0x1083   :  { %v1931_v20 = vpop.eup %1930 }
0x1084   :  { %v1667_v21 = vmul.f32 %v1931_v20, %v1655_v44  ;;  %vm1673_vm7 = vweird.f32 %v1931_v20 }
0x1085   :  { %vm1674_vm12 = vmor %vm1672_vm11, %vm1673_vm7 }
0x1086   :  { %v1668_v1 = vmul.f32 %v1931_v20, %v1667_v21 }
0x1088   :  { %v1669_v59 = vmul.f32 0.5, %v1668_v1 }
0x108a   :  { %v1670_v47 = vsub.f32 1.5, %v1669_v59 }
0x108c   :  { %v1671_v18 = vmul.f32 %v1931_v20, %v1670_v47 }
0x108e   :  { %v1675_v22 = vsel %vm1674_vm12, %v1931_v20, %v1671_v18 }
0x108f   :  { %v1677_v63 = vmul.f32 %v1675_v22, %v1643_v4 }
0x1091   :  { %v1680_v10 = vmul.f32 %v1844_v45, %v1677_v63 }
0x1093   :  { %v1683_v23 = vadd.f32 %v1845_v39, %v1680_v10 }
0x1095   :  { %1685 = vst.msk [vmem:[#allocation8 + $0x8] sm:$0xff] %vm102_vm0, %v1683_v23 }
0x1096   :  { %1698 = dma.vmem_to_hbm [thread:$0]  %s1691_s6, 256, %s1693_s22, [#allocation4], %s2037_s13, %s2037_s13, %s2038_s14  }
0x1097   :  { %2034 = dma.done.wait [#allocation4], 256  }
0x1098   :  { %2035 = vsyncadd [#allocation4], 4294967040 }
0x1099   :  { %1703 = vsyncpa [#allocation3], 1 }
0x109a   :  { %1704 = vsyncpa [#allocation6], 1 }
0x109b   :  { %1705 = vsyncpa [#allocation4], 1 }

</bundles_post_ra>
